<compile_context>
chip_gen: v6e
topology: v6e:2x2x1
jax: 0.10.0
libtpu: 0.0.40
codegen_flags: <defaults>
</compile_context>

<pallas_src>
import jax
import jax.numpy as jnp
from jax.experimental import pallas as pl
from jax.experimental.pallas import tpu as pltpu

# ------------------------- model hyper-parameters ---------------------------
HIDDEN = 32          # embedding / hidden dim of the module
H_PAD = 128          # lane-padded hidden dim used inside the kernel
N_LAYERS = 2         # message-passing layers in the encoder
N_NODE_FEAT = 3      # number of node embedding tables
N_EDGE_FEAT = 2      # number of edge embedding tables
NODE_VOCAB = 8       # vocab size of each node embedding
EDGE_VOCAB = 4       # vocab size of each edge embedding


# ------------------------------ Pallas kernel -------------------------------
def gnn_kernel(
    h0_ref,     # [Np, Hp]      bf16  initial node embeddings (resident)
    e_ref,      # [TE, Hp]      bf16  edge-feature tile
    s_ref,      # [TE, Np]      int8  src incidence tile (gather h[src])
    dt_ref,     # [Np, TE]      int8  dst incidence tile, node-major (scatter)
    p_ref,      # [B,  Np]      bf16  graph sum-pool matrix (resident)
    wmsg_ref,   # [1, Hp, Hp]   bf16  per-layer message weight
    bmsg_ref,   # [1, 1, Hp]    f32
    wupd_ref,   # [1, 2Hp, Hp]  bf16  fused [w_self ; w_nbr]
    bupd_ref,   # [1, 1, Hp]    f32
    w1_ref,     # [Hp, Hp]      bf16  decoder layer 1
    b1_ref,     # [1, Hp]       f32
    w2_ref,     # [1, Hp]       f32   decoder layer 2 as a row (VPU path)
    b2_ref,     # [1, 1]        f32
    out_ref,    # [B, 1]        f32
    hm_bf,      # VMEM [Np, 2Hp] bf16: [:, :Hp] = node state (bf16 cache),
                #                      [:, Hp:] = messages, written at layer end
    m_acc,      # VMEM [Np, Hp]  f32 : per-layer scatter accumulator
):
    l = pl.program_id(0)
    t = pl.program_id(1)
    last_l = pl.num_programs(0) - 1
    last_t = pl.num_programs(1) - 1

    # very first grid step: load the initial node state (already bf16)
    @pl.when(jnp.logical_and(l == 0, t == 0))
    def _():
        hm_bf[:, :H_PAD] = h0_ref[...]

    # start of every layer: clear the message accumulator
    @pl.when(t == 0)
    def _():
        m_acc[...] = jnp.zeros_like(m_acc)

    # ------------------- hot path: one tile of edges -------------------
    # bf16 node state is read straight from scratch -- no per-tile f32 reload
    # or cast (it only changes at layer boundaries).
    h_bf = hm_bf[:, :H_PAD]                                          # [Np, Hp]
    s_bf = s_ref[...].astype(jnp.bfloat16)      # 0/1 int8 -> bf16, exact
    h_src = jnp.dot(s_bf, h_bf, preferred_element_type=jnp.float32)  # [TE, Hp]
    pre = (h_src + e_ref[...].astype(jnp.float32)).astype(jnp.bfloat16)
    msg = jnp.maximum(
        jnp.dot(pre, wmsg_ref[0], preferred_element_type=jnp.float32)
        + bmsg_ref[0], 0.0)                                          # [TE, Hp]
    # scatter-add messages to destination nodes; padded edges have all-zero
    # columns in dt_ref, so their relu(b_msg) rows contribute nothing
    dt_bf = dt_ref[...].astype(jnp.bfloat16)
    m_acc[...] += jnp.dot(dt_bf, msg.astype(jnp.bfloat16),
                          preferred_element_type=jnp.float32)        # [Np, Hp]

    # --------------- end of layer: fused node update ---------------
    @pl.when(t == last_t)
    def _():
        # place messages next to the cached state and run one K=2*Hp matmul;
        # no concatenate temporary.
        hm_bf[:, H_PAD:] = m_acc[...].astype(jnp.bfloat16)
        new_h = jnp.maximum(
            jnp.dot(hm_bf[...], wupd_ref[0], preferred_element_type=jnp.float32)
            + bupd_ref[0], 0.0)
        # NOTE: padded node rows end up as relu(b_upd); masked out downstream
        # by the zero padded columns of S and P.
        hm_bf[:, :H_PAD] = new_h.astype(jnp.bfloat16)

    # --------------- final step: readout + decoder ---------------
    @pl.when(jnp.logical_and(l == last_l, t == last_t))
    def _():
        g = jnp.dot(p_ref[...], hm_bf[:, :H_PAD],
                    preferred_element_type=jnp.float32)              # [B, Hp]
        hid = jnp.maximum(
            jnp.dot(g.astype(jnp.bfloat16), w1_ref[...],
                    preferred_element_type=jnp.float32) + b1_ref[...], 0.0)
        # [Hp, 1] projection as VPU multiply + lane reduction (no 1-column MXU
        # pass, no lane-sparse result tile)
        out_ref[...] = (jnp.sum(hid * w2_ref[...], axis=-1, keepdims=True)
                        + b2_ref[...])


# ------------------------------ host wrapper --------------------------------
def _round_up(x, m):
    return ((x + m - 1) // m) * m


def _vmem_capacity_bytes():
    """Physical VMEM of the current chip; conservative fallback = v7x 64 MiB."""
    try:
        info = pltpu.get_tpu_info()
        for attr in ("vmem_capacity_bytes", "vmem_size_bytes", "vmem_bytes"):
            v = getattr(info, attr, None)
            if v:
                return int(v)
    except Exception:
        pass
    return 64 * 1024 * 1024


def _choose_edge_tile_and_vmem(n_pad, n_edges, n_graphs, edge_tile=None):
    """Chip-aware edge-tile / VMEM-limit selection.

    Double-buffered streamed working set per edge row: S + DT (int8) and the
    edge-feature row (bf16).  Resident: h0, P (double-buffered), the persistent
    node-state / accumulator scratch, and the (small) weights.  v7x (64 MiB)
    gets a smaller tile than v5e/v6e (128 MiB) automatically.
    """
    cap = _vmem_capacity_bytes()
    hp = H_PAD
    headroom = 16 * 1024 * 1024                       # Mosaic internal scratch
    resident = (2 * n_pad * hp * 2                    # h0 bf16, 2 pipeline bufs
                + 2 * n_graphs * n_pad * 2            # P  bf16, 2 pipeline bufs
                + n_pad * (2 * hp) * 2                # hm_bf scratch (bf16)
                + n_pad * hp * 4                      # m_acc scratch (f32)
                + (1 << 20))                          # weights / biases / misc
    per_edge_row = 2 * (n_pad                         # S  tile (int8), 2 bufs
                        + n_pad                       # DT tile (int8), 2 bufs
                        + hp * 2)                     # edge feats (bf16), 2 bufs
    if edge_tile is None:
        budget = cap - headroom - resident
        if budget > per_edge_row * 128:
            te = (budget // per_edge_row) // 128 * 128
        else:
            te = 128                                  # TODO(synk): node-tiled
        te = min(te, 2048)                            # variant for huge graphs
    else:
        te = max(128, _round_up(edge_tile, 128))
    te = int(min(te, _round_up(max(n_edges, 1), 128)))
    need = resident + per_edge_row * te + headroom
    vmem_limit = int(min(cap, max(need, 32 * 1024 * 1024)))
    return te, vmem_limit


def graph_dnn_forward(x_idx, edge_attr_idx, edge_index, batch, n_graphs,
                      params, edge_tile=None):
    """Builds padded int8/bf16 structure matrices and runs the fused kernel."""
    n_nodes = int(x_idx.shape[0])
    n_edges = int(edge_attr_idx.shape[0])
    H, Hp, L = HIDDEN, H_PAD, N_LAYERS

    # ---- embedding lookup + sum over feature columns (nn.Embedding gathers) ----
    h0 = jnp.zeros((n_nodes, H), jnp.float32)
    for f in range(N_NODE_FEAT):
        h0 = h0 + jnp.take(params["node_tables"][f], x_idx[:, f], axis=0)
    e0 = jnp.zeros((n_edges, H), jnp.float32)
    for f in range(N_EDGE_FEAT):
        e0 = e0 + jnp.take(params["edge_tables"][f], edge_attr_idx[:, f], axis=0)

    # ---- padding: nodes -> x128 (lane dim of S / int8 pack), edges -> tile ----
    n_pad = _round_up(max(n_nodes, 128), 128)
    te, vmem_limit = _choose_edge_tile_and_vmem(n_pad, n_edges, n_graphs,
                                                edge_tile)
    e_pad = _round_up(max(n_edges, te), te)
    n_tiles = e_pad // te

    h0p = jnp.zeros((n_pad, Hp), jnp.bfloat16).at[:n_nodes, :H].set(
        h0.astype(jnp.bfloat16))
    # TODO(synk): edge features are still zero-padded 32->128 lanes in HBM; a
    # 32-wide stream + in-kernel lane pad would cut this (secondary) stream 4x.
    e0p = jnp.zeros((e_pad, Hp), jnp.bfloat16).at[:n_edges, :H].set(
        e0.astype(jnp.bfloat16))

    src, dst = edge_index[0], edge_index[1]
    node_ids = jnp.arange(n_pad, dtype=src.dtype)
    graph_ids = jnp.arange(n_graphs, dtype=batch.dtype)
    # S[e, n]  = 1 iff src[e] == n   (gather h[src] as an MXU matmul), int8
    S = jnp.zeros((e_pad, n_pad), jnp.int8).at[:n_edges].set(
        (src[:, None] == node_ids[None, :]).astype(jnp.int8))
    # DT[n, e] = 1 iff dst[e] == n   (scatter-add; built directly, no transpose)
    DT = jnp.zeros((n_pad, e_pad), jnp.int8).at[:, :n_edges].set(
        (node_ids[:, None] == dst[None, :]).astype(jnp.int8))
    # P[b, n]  = 1 iff batch[n] == b (sum-pool readout); padded node cols zero
    P = jnp.zeros((n_graphs, n_pad), jnp.bfloat16).at[:, :n_nodes].set(
        (graph_ids[:, None] == batch[None, :]).astype(jnp.bfloat16))

    # ---- zero-pad weights H=32 -> Hp=128 (exact; padded lanes stay zero) ----
    wmsg = jnp.zeros((L, Hp, Hp), jnp.float32).at[:, :H, :H].set(
        params["w_msg"]).astype(jnp.bfloat16)
    bmsg = jnp.zeros((L, 1, Hp), jnp.float32).at[:, :, :H].set(params["b_msg"])
    wupd = jnp.zeros((L, 2 * Hp, Hp), jnp.float32)
    wupd = wupd.at[:, :H, :H].set(params["w_self"])
    wupd = wupd.at[:, Hp:Hp + H, :H].set(params["w_nbr"])
    wupd = wupd.astype(jnp.bfloat16)
    bupd = jnp.zeros((L, 1, Hp), jnp.float32).at[:, :, :H].set(params["b_upd"])
    w1 = jnp.zeros((Hp, Hp), jnp.float32).at[:H, :H].set(
        params["w1"]).astype(jnp.bfloat16)
    b1 = jnp.zeros((1, Hp), jnp.float32).at[:, :H].set(params["b1"])
    w2row = jnp.zeros((1, Hp), jnp.float32).at[:, :H].set(
        params["w2"].reshape(1, H))
    b2 = params["b2"].astype(jnp.float32)

    grid = (N_LAYERS, n_tiles)
    out = pl.pallas_call(
        gnn_kernel,
        out_shape=jax.ShapeDtypeStruct((n_graphs, 1), jnp.float32),
        grid_spec=pltpu.PrefetchScalarGridSpec(
            num_scalar_prefetch=0,
            grid=grid,
            in_specs=[
                pl.BlockSpec((n_pad, Hp), lambda l, t: (0, 0)),         # h0
                pl.BlockSpec((te, Hp), lambda l, t: (t, 0)),            # e_attr
                pl.BlockSpec((te, n_pad), lambda l, t: (t, 0)),         # S (i8)
                pl.BlockSpec((n_pad, te), lambda l, t: (0, t)),         # DT(i8)
                pl.BlockSpec((n_graphs, n_pad), lambda l, t: (0, 0)),   # P
                pl.BlockSpec((1, Hp, Hp), lambda l, t: (l, 0, 0)),      # w_msg
                pl.BlockSpec((1, 1, Hp), lambda l, t: (l, 0, 0)),       # b_msg
                pl.BlockSpec((1, 2 * Hp, Hp), lambda l, t: (l, 0, 0)),  # w_upd
                pl.BlockSpec((1, 1, Hp), lambda l, t: (l, 0, 0)),       # b_upd
                pl.BlockSpec((Hp, Hp), lambda l, t: (0, 0)),            # w1
                pl.BlockSpec((1, Hp), lambda l, t: (0, 0)),             # b1
                pl.BlockSpec((1, Hp), lambda l, t: (0, 0)),             # w2 row
                pl.BlockSpec((1, 1), lambda l, t: (0, 0)),              # b2
            ],
            out_specs=pl.BlockSpec((n_graphs, 1), lambda l, t: (0, 0)),
            scratch_shapes=[
                pltpu.VMEM((n_pad, 2 * Hp), jnp.bfloat16),  # [h | m] state
                pltpu.VMEM((n_pad, Hp), jnp.float32),       # scatter accumulator
            ],
        ),
        compiler_params=pltpu.CompilerParams(
            # both axes carry sequential state (layer recurrence, edge-tile
            # reduction), so they must be 'arbitrary'
            dimension_semantics=("arbitrary", "arbitrary"),
            vmem_limit_bytes=vmem_limit,
        ),
    )(h0p, e0p, S, DT, P, wmsg, bmsg, wupd, bupd, w1, b1, w2row, b2)
    return out


# -------------------------- pure-JAX reference -------------------------------
def reference_forward(x_idx, edge_attr_idx, edge_index, batch, n_graphs, params):
    n_nodes = x_idx.shape[0]
    h = jnp.zeros((n_nodes, HIDDEN), jnp.float32)
    for f in range(N_NODE_FEAT):
        h = h + jnp.take(params["node_tables"][f], x_idx[:, f], axis=0)
    e = jnp.zeros((edge_attr_idx.shape[0], HIDDEN), jnp.float32)
    for f in range(N_EDGE_FEAT):
        e = e + jnp.take(params["edge_tables"][f], edge_attr_idx[:, f], axis=0)
    src, dst = edge_index[0], edge_index[1]
    for l in range(N_LAYERS):
        h_src = h[src]
        msg = jax.nn.relu((h_src + e) @ params["w_msg"][l] + params["b_msg"][l])
        m = jnp.zeros((n_nodes, HIDDEN), jnp.float32).at[dst].add(msg)
        h = jax.nn.relu(h @ params["w_self"][l] + m @ params["w_nbr"][l]
                        + params["b_upd"][l])
    g = jnp.zeros((n_graphs, HIDDEN), jnp.float32).at[batch].add(h)
    hid = jax.nn.relu(g @ params["w1"] + params["b1"])
    return hid @ params["w2"] + params["b2"]


# --------------------------------- main --------------------------------------
if __name__ == "__main__":
    key = jax.random.PRNGKey(0)
    ks = jax.random.split(key, 16)

    def init(k, shape, scale=0.1):
        return (scale * jax.random.normal(k, shape)).astype(jnp.float32)

    params = {
        "node_tables": init(ks[0], (N_NODE_FEAT, NODE_VOCAB, HIDDEN)),
        "edge_tables": init(ks[1], (N_EDGE_FEAT, EDGE_VOCAB, HIDDEN)),
        "w_msg":  init(ks[2], (N_LAYERS, HIDDEN, HIDDEN)),
        "b_msg":  init(ks[3], (N_LAYERS, 1, HIDDEN)),
        "w_self": init(ks[4], (N_LAYERS, HIDDEN, HIDDEN)),
        "w_nbr":  init(ks[5], (N_LAYERS, HIDDEN, HIDDEN)),
        "b_upd":  init(ks[6], (N_LAYERS, 1, HIDDEN)),
        "w1":     init(ks[7], (HIDDEN, HIDDEN)),
        "b1":     init(ks[8], (1, HIDDEN)),
        "w2":     init(ks[9], (HIDDEN, 1)),
        "b2":     init(ks[10], (1, 1)),
    }

    # small synthetic graph batch: 2 graphs, 24 nodes, 200 edges
    # (forced edge_tile=128 -> edges padded to 256 -> 2 pipelined edge tiles,
    #  exercising the multi-tile scatter accumulation path)
    n_nodes, n_edges, n_graphs = 24, 200, 2
    x_idx = jax.random.randint(ks[11], (n_nodes, N_NODE_FEAT), 0, NODE_VOCAB)
    edge_attr_idx = jax.random.randint(ks[12], (n_edges, N_EDGE_FEAT), 0, EDGE_VOCAB)
    edge_index = jax.random.randint(ks[13], (2, n_edges), 0, n_nodes)
    batch = jnp.concatenate([jnp.zeros(n_nodes // 2, jnp.int32),
                             jnp.ones(n_nodes - n_nodes // 2, jnp.int32)])

    out = graph_dnn_forward(x_idx, edge_attr_idx, edge_index, batch,
                            n_graphs, params, edge_tile=128)
    out = jax.block_until_ready(out)

    ref = reference_forward(x_idx, edge_attr_idx, edge_index, batch,
                            n_graphs, params)
    assert out.shape == (n_graphs, 1)
    # tolerance sized for bf16 MXU operands (f32 accumulation) vs f32 reference
    assert jnp.allclose(out, ref, atol=2e-2, rtol=2e-2), (out, ref)

    print("KERNEL_OK")
</pallas_src>

<mosaic_0001>
module attributes {stable_mosaic.version = 11 : i64} {
  func.func @gnn_kernel(%arg0: i32, %arg1: i32, %arg2: memref<128x128xbf16, #tpu.memory_space<vmem>>, %arg3: memref<128x128xbf16, #tpu.memory_space<vmem>>, %arg4: memref<128x128xi8, #tpu.memory_space<vmem>>, %arg5: memref<128x128xi8, #tpu.memory_space<vmem>>, %arg6: memref<2x128xbf16, #tpu.memory_space<vmem>>, %arg7: memref<1x128x128xbf16, #tpu.memory_space<vmem>>, %arg8: memref<1x1x128xf32, #tpu.memory_space<vmem>>, %arg9: memref<1x256x128xbf16, #tpu.memory_space<vmem>>, %arg10: memref<1x1x128xf32, #tpu.memory_space<vmem>>, %arg11: memref<128x128xbf16, #tpu.memory_space<vmem>>, %arg12: memref<1x128xf32, #tpu.memory_space<vmem>>, %arg13: memref<1x128xf32, #tpu.memory_space<vmem>>, %arg14: memref<1x1xf32, #tpu.memory_space<vmem>>, %arg15: memref<2x1xf32, #tpu.memory_space<vmem>>, %arg16: memref<128x256xbf16, #tpu.memory_space<vmem>>, %arg17: memref<128x128xf32, #tpu.memory_space<vmem>>) attributes {dimension_semantics = [#tpu.dimension_semantics<arbitrary>, #tpu.dimension_semantics<arbitrary>], iteration_bounds = array<i64: 2, 2>, scalar_prefetch = 0 : i64, scratch_operands = 2 : i64, tpu.core_type = #tpu.core_type<tc>, window_params = [{pipeline_mode = #tpu.pipeline_mode<synchronous>, transform_indices = @transform_0, window_bounds = array<i64: 128, 128>}, {transform_indices = @transform_1, window_bounds = array<i64: 128, 128>}, {transform_indices = @transform_2, window_bounds = array<i64: 128, 128>}, {transform_indices = @transform_3, window_bounds = array<i64: 128, 128>}, {pipeline_mode = #tpu.pipeline_mode<synchronous>, transform_indices = @transform_4, window_bounds = array<i64: 2, 128>}, {transform_indices = @transform_5, window_bounds = array<i64: 1, 128, 128>}, {transform_indices = @transform_6, window_bounds = array<i64: 1, 1, 128>}, {transform_indices = @transform_7, window_bounds = array<i64: 1, 256, 128>}, {transform_indices = @transform_8, window_bounds = array<i64: 1, 1, 128>}, {pipeline_mode = #tpu.pipeline_mode<synchronous>, transform_indices = @transform_9, window_bounds = array<i64: 128, 128>}, {pipeline_mode = #tpu.pipeline_mode<synchronous>, transform_indices = @transform_10, window_bounds = array<i64: 1, 128>}, {pipeline_mode = #tpu.pipeline_mode<synchronous>, transform_indices = @transform_11, window_bounds = array<i64: 1, 128>}, {pipeline_mode = #tpu.pipeline_mode<synchronous>, transform_indices = @transform_12, window_bounds = array<i64: 1, 1>}, {pipeline_mode = #tpu.pipeline_mode<synchronous>, transform_indices = @transform_13, window_bounds = array<i64: 2, 1>}]} {
    %c0_i32 = arith.constant 0 : i32
    %0 = arith.cmpi eq, %arg0, %c0_i32 : i32
    %c0_i32_0 = arith.constant 0 : i32
    %1 = arith.cmpi eq, %arg1, %c0_i32_0 : i32
    %2 = arith.andi %0, %1 : i1
    %3 = arith.extui %2 : i1 to i32
    %c0_i32_1 = arith.constant 0 : i32
    %4 = arith.cmpi ne, %3, %c0_i32_1 : i32
    scf.if %4 {
      %c0_28 = arith.constant 0 : index
      %c0_29 = arith.constant 0 : index
      %40 = vector.load %arg2[%c0_28, %c0_29] : memref<128x128xbf16, #tpu.memory_space<vmem>>, vector<128x128xbf16>
      %c0_30 = arith.constant 0 : index
      %c0_31 = arith.constant 0 : index
      %41 = vector.load %arg16[%c0_30, %c0_31] : memref<128x256xbf16, #tpu.memory_space<vmem>>, vector<128x128xbf16>
      tpu.vector_store %arg16[%c0_30, %c0_31], %40 {strides = array<i32>} : memref<128x256xbf16, #tpu.memory_space<vmem>>, vector<128x128xbf16>,
    } else {
    }
    %c0_i32_2 = arith.constant 0 : i32
    %5 = arith.cmpi eq, %arg1, %c0_i32_2 : i32
    %6 = arith.extui %5 : i1 to i32
    %c0_i32_3 = arith.constant 0 : i32
    %7 = arith.cmpi ne, %6, %c0_i32_3 : i32
    scf.if %7 {
      %cst_28 = arith.constant 0.000000e+00 : f32
      %40 = vector.broadcast %cst_28 : f32 to vector<128x128xf32>
      %c0_29 = arith.constant 0 : index
      %c0_30 = arith.constant 0 : index
      %41 = vector.load %arg17[%c0_29, %c0_30] : memref<128x128xf32, #tpu.memory_space<vmem>>, vector<128x128xf32>
      tpu.vector_store %arg17[%c0_29, %c0_30], %40 {strides = array<i32>} : memref<128x128xf32, #tpu.memory_space<vmem>>, vector<128x128xf32>,
    } else {
    }
    %c0 = arith.constant 0 : index
    %c0_4 = arith.constant 0 : index
    %8 = vector.load %arg16[%c0, %c0_4] : memref<128x256xbf16, #tpu.memory_space<vmem>>, vector<128x128xbf16>
    %c0_5 = arith.constant 0 : index
    %c0_6 = arith.constant 0 : index
    %9 = vector.load %arg4[%c0_5, %c0_6] : memref<128x128xi8, #tpu.memory_space<vmem>>, vector<128x128xi8>
    %10 = arith.sitofp %9 : vector<128x128xi8> to vector<128x128xbf16>
    %cst = arith.constant dense<0.000000e+00> : vector<128x128xf32>
    %11 = tpu.matmul %10, %8, %cst {dimension_numbers = #tpu.dot_dimension_numbers<[1], [0], [0], [1], [0, 0, 1, 1], [], []>} : vector<128x128xbf16>, vector<128x128xbf16>, vector<128x128xf32> -> vector<128x128xf32>
    %c0_7 = arith.constant 0 : index
    %c0_8 = arith.constant 0 : index
    %12 = vector.load %arg3[%c0_7, %c0_8] : memref<128x128xbf16, #tpu.memory_space<vmem>>, vector<128x128xbf16>
    %13 = arith.extf %12 : vector<128x128xbf16> to vector<128x128xf32>
    %14 = arith.addf %11, %13 : vector<128x128xf32>
    %15 = arith.truncf %14 : vector<128x128xf32> to vector<128x128xbf16>
    %c0_9 = arith.constant 0 : index
    %c0_10 = arith.constant 0 : index
    %c0_11 = arith.constant 0 : index
    %16 = vector.load %arg7[%c0_9, %c0_10, %c0_11] : memref<1x128x128xbf16, #tpu.memory_space<vmem>>, vector<1x128x128xbf16>
    %17 = vector.shape_cast %16 : vector<1x128x128xbf16> to vector<128x128xbf16>
    %cst_12 = arith.constant dense<0.000000e+00> : vector<128x128xf32>
    %18 = tpu.matmul %15, %17, %cst_12 {dimension_numbers = #tpu.dot_dimension_numbers<[1], [0], [0], [1], [0, 0, 1, 1], [], []>} : vector<128x128xbf16>, vector<128x128xbf16>, vector<128x128xf32> -> vector<128x128xf32>
    %c0_13 = arith.constant 0 : index
    %c0_14 = arith.constant 0 : index
    %c0_15 = arith.constant 0 : index
    %19 = vector.load %arg8[%c0_13, %c0_14, %c0_15] : memref<1x1x128xf32, #tpu.memory_space<vmem>>, vector<1x1x128xf32>
    %20 = vector.shape_cast %19 : vector<1x1x128xf32> to vector<1x128xf32>
    %21 = vector.broadcast %20 : vector<1x128xf32> to vector<128x128xf32>
    %22 = arith.addf %18, %21 : vector<128x128xf32>
    %cst_16 = arith.constant 0.000000e+00 : f32
    %23 = vector.broadcast %cst_16 : f32 to vector<128x128xf32>
    %24 = arith.maximumf %22, %23 : vector<128x128xf32>
    %c0_17 = arith.constant 0 : index
    %c0_18 = arith.constant 0 : index
    %25 = vector.load %arg5[%c0_17, %c0_18] : memref<128x128xi8, #tpu.memory_space<vmem>>, vector<128x128xi8>
    %26 = arith.sitofp %25 : vector<128x128xi8> to vector<128x128xbf16>
    %c0_19 = arith.constant 0 : index
    %c0_20 = arith.constant 0 : index
    %27 = vector.load %arg17[%c0_19, %c0_20] : memref<128x128xf32, #tpu.memory_space<vmem>>, vector<128x128xf32>
    %28 = arith.truncf %24 : vector<128x128xf32> to vector<128x128xbf16>
    %cst_21 = arith.constant dense<0.000000e+00> : vector<128x128xf32>
    %29 = tpu.matmul %26, %28, %cst_21 {dimension_numbers = #tpu.dot_dimension_numbers<[1], [0], [0], [1], [0, 0, 1, 1], [], []>} : vector<128x128xbf16>, vector<128x128xbf16>, vector<128x128xf32> -> vector<128x128xf32>
    %30 = arith.addf %27, %29 : vector<128x128xf32>
    %c0_22 = arith.constant 0 : index
    %c0_23 = arith.constant 0 : index
    %31 = vector.load %arg17[%c0_22, %c0_23] : memref<128x128xf32, #tpu.memory_space<vmem>>, vector<128x128xf32>
    tpu.vector_store %arg17[%c0_22, %c0_23], %30 {strides = array<i32>} : memref<128x128xf32, #tpu.memory_space<vmem>>, vector<128x128xf32>,
    %c1_i32 = arith.constant 1 : i32
    %32 = arith.cmpi eq, %arg1, %c1_i32 : i32
    %33 = arith.extui %32 : i1 to i32
    %c0_i32_24 = arith.constant 0 : i32
    %34 = arith.cmpi ne, %33, %c0_i32_24 : i32
    scf.if %34 {
      %c0_28 = arith.constant 0 : index
      %c0_29 = arith.constant 0 : index
      %40 = vector.load %arg17[%c0_28, %c0_29] : memref<128x128xf32, #tpu.memory_space<vmem>>, vector<128x128xf32>
      %41 = arith.truncf %40 : vector<128x128xf32> to vector<128x128xbf16>
      %c0_30 = arith.constant 0 : index
      %c128 = arith.constant 128 : index
      %42 = vector.load %arg16[%c0_30, %c128] : memref<128x256xbf16, #tpu.memory_space<vmem>>, vector<128x128xbf16>
      tpu.vector_store %arg16[%c0_30, %c128], %41 {strides = array<i32>} : memref<128x256xbf16, #tpu.memory_space<vmem>>, vector<128x128xbf16>,
      %c0_31 = arith.constant 0 : index
      %c0_32 = arith.constant 0 : index
      %43 = vector.load %arg16[%c0_31, %c0_32] : memref<128x256xbf16, #tpu.memory_space<vmem>>, vector<128x256xbf16>
      %c0_33 = arith.constant 0 : index
      %c0_34 = arith.constant 0 : index
      %c0_35 = arith.constant 0 : index
      %44 = vector.load %arg9[%c0_33, %c0_34, %c0_35] : memref<1x256x128xbf16, #tpu.memory_space<vmem>>, vector<1x256x128xbf16>
      %45 = vector.shape_cast %44 : vector<1x256x128xbf16> to vector<256x128xbf16>
      %cst_36 = arith.constant dense<0.000000e+00> : vector<128x128xf32>
      %46 = tpu.matmul %43, %45, %cst_36 {dimension_numbers = #tpu.dot_dimension_numbers<[1], [0], [0], [1], [0, 0, 1, 1], [], []>} : vector<128x256xbf16>, vector<256x128xbf16>, vector<128x128xf32> -> vector<128x128xf32>
      %c0_37 = arith.constant 0 : index
      %c0_38 = arith.constant 0 : index
      %c0_39 = arith.constant 0 : index
      %47 = vector.load %arg10[%c0_37, %c0_38, %c0_39] : memref<1x1x128xf32, #tpu.memory_space<vmem>>, vector<1x1x128xf32>
      %48 = vector.shape_cast %47 : vector<1x1x128xf32> to vector<1x128xf32>
      %49 = vector.broadcast %48 : vector<1x128xf32> to vector<128x128xf32>
      %50 = arith.addf %46, %49 : vector<128x128xf32>
      %cst_40 = arith.constant 0.000000e+00 : f32
      %51 = vector.broadcast %cst_40 : f32 to vector<128x128xf32>
      %52 = arith.maximumf %50, %51 : vector<128x128xf32>
      %53 = arith.truncf %52 : vector<128x128xf32> to vector<128x128xbf16>
      %c0_41 = arith.constant 0 : index
      %c0_42 = arith.constant 0 : index
      %54 = vector.load %arg16[%c0_41, %c0_42] : memref<128x256xbf16, #tpu.memory_space<vmem>>, vector<128x128xbf16>
      tpu.vector_store %arg16[%c0_41, %c0_42], %53 {strides = array<i32>} : memref<128x256xbf16, #tpu.memory_space<vmem>>, vector<128x128xbf16>,
    } else {
    }
    %c1_i32_25 = arith.constant 1 : i32
    %35 = arith.cmpi eq, %arg0, %c1_i32_25 : i32
    %c1_i32_26 = arith.constant 1 : i32
    %36 = arith.cmpi eq, %arg1, %c1_i32_26 : i32
    %37 = arith.andi %35, %36 : i1
    %38 = arith.extui %37 : i1 to i32
    %c0_i32_27 = arith.constant 0 : i32
    %39 = arith.cmpi ne, %38, %c0_i32_27 : i32
    scf.if %39 {
      %c0_28 = arith.constant 0 : index
      %c0_29 = arith.constant 0 : index
      %40 = vector.load %arg6[%c0_28, %c0_29] : memref<2x128xbf16, #tpu.memory_space<vmem>>, vector<2x128xbf16>
      %c0_30 = arith.constant 0 : index
      %c0_31 = arith.constant 0 : index
      %41 = vector.load %arg16[%c0_30, %c0_31] : memref<128x256xbf16, #tpu.memory_space<vmem>>, vector<128x128xbf16>
      %cst_32 = arith.constant dense<0.000000e+00> : vector<2x128xf32>
      %42 = tpu.matmul %40, %41, %cst_32 {dimension_numbers = #tpu.dot_dimension_numbers<[1], [0], [0], [1], [0, 0, 1, 1], [], []>} : vector<2x128xbf16>, vector<128x128xbf16>, vector<2x128xf32> -> vector<2x128xf32>
      %43 = arith.truncf %42 : vector<2x128xf32> to vector<2x128xbf16>
      %c0_33 = arith.constant 0 : index
      %c0_34 = arith.constant 0 : index
      %44 = vector.load %arg11[%c0_33, %c0_34] : memref<128x128xbf16, #tpu.memory_space<vmem>>, vector<128x128xbf16>
      %cst_35 = arith.constant dense<0.000000e+00> : vector<2x128xf32>
      %45 = tpu.matmul %43, %44, %cst_35 {dimension_numbers = #tpu.dot_dimension_numbers<[1], [0], [0], [1], [0, 0, 1, 1], [], []>} : vector<2x128xbf16>, vector<128x128xbf16>, vector<2x128xf32> -> vector<2x128xf32>
      %c0_36 = arith.constant 0 : index
      %c0_37 = arith.constant 0 : index
      %46 = vector.load %arg12[%c0_36, %c0_37] : memref<1x128xf32, #tpu.memory_space<vmem>>, vector<1x128xf32>
      %47 = vector.broadcast %46 : vector<1x128xf32> to vector<2x128xf32>
      %48 = arith.addf %45, %47 : vector<2x128xf32>
      %cst_38 = arith.constant 0.000000e+00 : f32
      %49 = vector.broadcast %cst_38 : f32 to vector<2x128xf32>
      %50 = arith.maximumf %48, %49 : vector<2x128xf32>
      %c0_39 = arith.constant 0 : index
      %c0_40 = arith.constant 0 : index
      %51 = vector.load %arg13[%c0_39, %c0_40] : memref<1x128xf32, #tpu.memory_space<vmem>>, vector<1x128xf32>
      %52 = vector.broadcast %51 : vector<1x128xf32> to vector<2x128xf32>
      %53 = arith.mulf %50, %52 : vector<2x128xf32>
      %cst_41 = arith.constant dense<0.000000e+00> : vector<2xf32>
      %54 = vector.multi_reduction <add>, %53, %cst_41 [1] : vector<2x128xf32> to vector<2xf32>
      %55 = vector.shape_cast %54 : vector<2xf32> to vector<2x1xf32>
      %c0_42 = arith.constant 0 : index
      %c0_43 = arith.constant 0 : index
      %56 = vector.load %arg14[%c0_42, %c0_43] : memref<1x1xf32, #tpu.memory_space<vmem>>, vector<1x1xf32>
      %57 = vector.broadcast %56 : vector<1x1xf32> to vector<2x1xf32>
      %58 = arith.addf %55, %57 : vector<2x1xf32>
      %c0_44 = arith.constant 0 : index
      %c0_45 = arith.constant 0 : index
      %59 = vector.load %arg15[%c0_44, %c0_45] : memref<2x1xf32, #tpu.memory_space<vmem>>, vector<2x1xf32>
      tpu.vector_store %arg15[%c0_44, %c0_45], %58 {strides = array<i32>} : memref<2x1xf32, #tpu.memory_space<vmem>>, vector<2x1xf32>,
    } else {
    }
    return
  }
  func.func @transform_0(%arg0: i32, %arg1: i32) -> (i32, i32) {
    %c0_i32 = arith.constant 0 : i32
    %c0_i32_0 = arith.constant 0 : i32
    %c0_i32_1 = arith.constant 0 : i32
    return %c0_i32, %c0_i32_0 : i32, i32
  }
  func.func @transform_1(%arg0: i32, %arg1: i32) -> (i32, i32) {
    %c0_i32 = arith.constant 0 : i32
    %c0_i32_0 = arith.constant 0 : i32
    return %arg1, %c0_i32 : i32, i32
  }
  func.func @transform_2(%arg0: i32, %arg1: i32) -> (i32, i32) {
    %c0_i32 = arith.constant 0 : i32
    %c0_i32_0 = arith.constant 0 : i32
    return %arg1, %c0_i32 : i32, i32
  }
  func.func @transform_3(%arg0: i32, %arg1: i32) -> (i32, i32) {
    %c0_i32 = arith.constant 0 : i32
    %c0_i32_0 = arith.constant 0 : i32
    return %c0_i32, %arg1 : i32, i32
  }
  func.func @transform_4(%arg0: i32, %arg1: i32) -> (i32, i32) {
    %c0_i32 = arith.constant 0 : i32
    %c0_i32_0 = arith.constant 0 : i32
    %c0_i32_1 = arith.constant 0 : i32
    return %c0_i32, %c0_i32_0 : i32, i32
  }
  func.func @transform_5(%arg0: i32, %arg1: i32) -> (i32, i32, i32) {
    %c0_i32 = arith.constant 0 : i32
    %c0_i32_0 = arith.constant 0 : i32
    %c0_i32_1 = arith.constant 0 : i32
    return %arg0, %c0_i32, %c0_i32_0 : i32, i32, i32
  }
  func.func @transform_6(%arg0: i32, %arg1: i32) -> (i32, i32, i32) {
    %c0_i32 = arith.constant 0 : i32
    %c0_i32_0 = arith.constant 0 : i32
    %c0_i32_1 = arith.constant 0 : i32
    return %arg0, %c0_i32, %c0_i32_0 : i32, i32, i32
  }
  func.func @transform_7(%arg0: i32, %arg1: i32) -> (i32, i32, i32) {
    %c0_i32 = arith.constant 0 : i32
    %c0_i32_0 = arith.constant 0 : i32
    %c0_i32_1 = arith.constant 0 : i32
    return %arg0, %c0_i32, %c0_i32_0 : i32, i32, i32
  }
  func.func @transform_8(%arg0: i32, %arg1: i32) -> (i32, i32, i32) {
    %c0_i32 = arith.constant 0 : i32
    %c0_i32_0 = arith.constant 0 : i32
    %c0_i32_1 = arith.constant 0 : i32
    return %arg0, %c0_i32, %c0_i32_0 : i32, i32, i32
  }
  func.func @transform_9(%arg0: i32, %arg1: i32) -> (i32, i32) {
    %c0_i32 = arith.constant 0 : i32
    %c0_i32_0 = arith.constant 0 : i32
    %c0_i32_1 = arith.constant 0 : i32
    return %c0_i32, %c0_i32_0 : i32, i32
  }
  func.func @transform_10(%arg0: i32, %arg1: i32) -> (i32, i32) {
    %c0_i32 = arith.constant 0 : i32
    %c0_i32_0 = arith.constant 0 : i32
    %c0_i32_1 = arith.constant 0 : i32
    return %c0_i32, %c0_i32_0 : i32, i32
  }
  func.func @transform_11(%arg0: i32, %arg1: i32) -> (i32, i32) {
    %c0_i32 = arith.constant 0 : i32
    %c0_i32_0 = arith.constant 0 : i32
    %c0_i32_1 = arith.constant 0 : i32
    return %c0_i32, %c0_i32_0 : i32, i32
  }
  func.func @transform_12(%arg0: i32, %arg1: i32) -> (i32, i32) {
    %c0_i32 = arith.constant 0 : i32
    %c0_i32_0 = arith.constant 0 : i32
    %c0_i32_1 = arith.constant 0 : i32
    return %c0_i32, %c0_i32_0 : i32, i32
  }
  func.func @transform_13(%arg0: i32, %arg1: i32) -> (i32, i32) {
    %c0_i32 = arith.constant 0 : i32
    %c0_i32_0 = arith.constant 0 : i32
    %c0_i32_1 = arith.constant 0 : i32
    return %c0_i32, %c0_i32_0 : i32, i32
  }
}

</mosaic_0001>

<bundles_post_ra>
// kernel: tpu_custom_call.1
= control target key start
LH: loop header
LB: loop body
LE: loop exit
PB: predicated region body
PF: predicated region fallthrough
CT: control target
= control target key end

     0   :  { %s3779_s0 = inlined_call_operand.hbm [shape: bf16[128,128], index: 0, kind: input, shape index: {}]   ;;  %s3780_s1 = inlined_call_operand.hbm [shape: bf16[256,128], index: 1, kind: input, shape index: {}]   ;;  %s3781_s2 = inlined_call_operand.hbm [shape: s8[256,128], index: 2, kind: input, shape index: {}]   ;;  %s3782_s3 = inlined_call_operand.hbm [shape: s8[128,256], index: 3, kind: input, shape index: {}]   ;;  %s3783_s4 = inlined_call_operand.vmem [shape: bf16[2,128], index: 4, kind: input, shape index: {}]   ;;  %s3784_s5 = inlined_call_operand.hbm [shape: bf16[2,128,128], index: 5, kind: input, shape index: {}]   ;;  %s3785_s6 = inlined_call_operand.vmem [shape: f32[2,1,128], index: 6, kind: input, shape index: {}]   ;;  %s3786_s7 = inlined_call_operand.hbm [shape: bf16[2,256,128], index: 7, kind: input, shape index: {}]   ;;  %s3787_s8 = inlined_call_operand.vmem [shape: f32[2,1,128], index: 8, kind: input, shape index: {}]   ;;  %s3788_s9 = inlined_call_operand.hbm [shape: bf16[128,128], index: 9, kind: input, shape index: {}]   ;;  %s3789_s10 = inlined_call_operand.vmem [shape: f32[1,128], index: 10, kind: input, shape index: {}]   ;;  %s3790_s11 = inlined_call_operand.vmem [shape: f32[1,128], index: 11, kind: input, shape index: {}]   ;;  %s3791_s12 = inlined_call_operand.<no memory space> [shape: f32[1,1], index: 12, kind: input, shape index: {}]   ;;  %s3792_s13 = inlined_call_operand.vmem [shape: f32[2,1], index: 13, kind: output, shape index: {}]  }
   0x1   :  { %3816 = sst [smem:[#allocation32_spill]] %s3780_s1  ;;  %v18_v0 = vstv %s3791_s12 }
   0x2   :  { %3817 = sst [smem:[#allocation33_spill]] %s3783_s4  ;;  %19 = vst [vmem:[#allocation4] sm:$0x1] %v18_v0 }
   0x3   :  { %3818 = sst [smem:[#allocation34_spill]] %s3785_s6 }
   0x4   :  { %3819 = sst [smem:[#allocation35_spill]] %s3787_s8 }
   0x5   :  { %3820 = sst [smem:[#allocation36_spill]] %s3788_s9 }
   0x6   :  { %3821 = sst [smem:[#allocation37_spill]] %s3789_s10 }
   0x7   :  { %3822 = sst [smem:[#allocation38_spill]] %s3790_s11 }
   0x8   :  { %3823 = sst [smem:[#allocation39_spill]] %s3792_s13 }
   0x9   :  { %20 = vsyncpa [#allocation6], 0 }
   0xa   :  { %21 = vsyncpa [#allocation8], 0 }
   0xb   :  { %23 = vsyncpa [#allocation8 + $0x1], 0 }
   0xc   :  { %24 = vsyncpa [#allocation11], 0 }
   0xd   :  { %26 = vsyncpa [#allocation11 + $0x1], 0 }
   0xe   :  { %27 = vsyncpa [#allocation14], 0 }
   0xf   :  { %29 = vsyncpa [#allocation14 + $0x1], 0  ;;  %s3350_s27 = smov 0   ;;  %s3352_s28 = smov 0  }
  0x10   :  { %s3354_s29 = smov 0   ;;  %s3356_s30 = smov 0  }
  0x11   :  { %s3358_s14 = smov 0   ;;  %s3360_s15 = smov 0  }
  0x12   :  { %s3362_s12 = smov 0   ;;  %s3364_s16 = smov 0  }
  0x13   :  { %s3366_s17 = smov 0   ;;  %s3368_s18 = smov 0  }
  0x14   :  { %s3370_s19 = smov 0  }
  0x15 LB: > { %3824 = sst [smem:[#allocation22_spill]] %s3236_s14  ;;  %s3793_s20 = sadd.s32 4294967295, %s3260_s19   ;;  %s3260_s19 = sphi %s3370_s19, %s35_s19   ;;  %s3256_s18 = sphi %s3368_s18, %s3882_s18   ;;  %s3252_s17 = sphi %s3366_s17, %s3881_s17   ;;  %s3248_s16 = sphi %s3364_s16, %s3880_s16   ;;  %s3244_s12 = sphi %s3362_s12, %s3879_s12   ;;  %s3240_s15 = sphi %s3360_s15, %s3874_s15   ;;  %s3236_s14 = sphi %s3358_s14, %s3873_s14   ;;  %s3232_s30 = sphi %s3356_s30, %s3872_s30   ;;  %s3228_s29 = sphi %s3354_s29, %s3878_s29   ;;  %s3224_s28 = sphi %s3352_s28, %s3877_s28   ;;  %s3220_s27 = sphi %s3350_s27, %s3876_s27  }
  0x16   : > { %3825 = sst [smem:[#allocation23_spill]] %s3240_s15  ;;  %p88_p0 = scmp.ne.s32.totalorder %s3236_s14, %s3232_s30 }
  0x17   : > { %3826 = sst [smem:[#allocation24_spill]] %s3244_s12  ;;  %p3405_p1 = scmp.eq.s32.totalorder %s3793_s20, 0 }
  0x18   : > { %3827 = sst [smem:[#allocation25_spill]] %s3248_s16  ;;  %p187_p2 = scmp.ne.s32.totalorder %s3224_s28, %s3220_s27 }
  0x19   : > { %s3828_s21 = scalar_select %p3405_p1, 1, 0 }
  0x1a   : > { %p2238_p3 = scmp.ge.s32.totalorder %s3260_s19, 1  ;;  %p381_p4 = scmp.lt.s32.totalorder %s3260_s19, 5 }
  0x1b   : > { %3829 = sst [smem:[#allocation26_spill]] %s3828_s21  ;;  %p3414_p5 = por %p3405_p1, %p88_p0 }
  0x1c   : > { %p3420_p6 = por %p187_p2, %p3405_p1  ;;  %p3424_p7 = pnand %p2238_p3, %p381_p4 }
  0x1d   : > { %s3830_s22 = scalar_select %p3414_p5, 1, 0 }
  0x1e   : > { %s3832_s23 = scalar_select %p3420_p6, 1, 0 }
  0x1f   : > { %3831 = sst [smem:[#allocation27_spill]] %s3830_s22  ;;  %p2760_p8 = pneg %p3424_p7 }
  0x20   : > { %3833 = sst [smem:[#allocation28_spill]] %s3832_s23  ;;  %s3262_s25 = smov [#allocation15]  }
  0x21   : > { %s3834_s24 = scalar_select %p3424_p7, 1, 0 }
  0x22   : > { %s409_s26 = sshll.u32 %s3262_s25, 4  ;;  %p3432_p9 = pnand %p2760_p8, %p3405_p1  ;;  %s410_s26 = int_to_ptr.vmem [resolvable:$true] %s409_s26 }
  0x23   : > { %3835 = sst [smem:[#allocation29_spill]] %s3834_s24  ;;  %s2969_s30 = scalar_lea.vmem %s410_s26, 1024 }
  0x24   : > { %p3807_p10 = pneg %p3432_p9  ;;  %p2970_p11 = scmp.ne.s32.totalorder %s410_s26, %s2969_s30 }
  0x25   : > { %p2977_p0 = scmp.lt.s32.totalorder %s410_s26, %s410_s26  ;;  %p2978_p2 = scmp.lt.s32.totalorder %s2969_s30, %s2969_s30 }
  0x26   : > { %p2972_p12 = pnand %p2970_p11, %p3807_p10 }
  0x27   : > { %p2979_p3 = por %p2978_p2, %p2977_p0 }
  0x28   : > { %p2973_p13 = pneg %p2972_p12 }
  0x2a   : > { %p2980_p4 = pnand %p2979_p3, %p2973_p13 }
  0x2c   : > { %2983 = shalt.err (!%p2980_p4)
}
  0x2d   : > { %s3794_s25 = smov 64   ;;  %s3796_s20 = smov 4  }
  0x2e   : > { %s3837_s9 = sld [smem:[#allocation36_spill]]  ;;  %s44_s11 = sadd.s32 1, %s3252_s17 }
  0x2f   : > { %p3450_p8 = scmp.ge.s32.totalorder %s44_s11, 2  ;;  %s75_s4 = sadd.s32 1, %s3240_s15 }
  0x30   : > { %p82_p11 = scmp.ne.s32.totalorder %s3240_s15, %s3236_s14  ;;  %p3805_p12 = scmp.eq.s32.totalorder %s3260_s19, 0 }
  0x31   : > { %s3884_s11 = smov (%p3450_p8, %s44_s11), 0  ;;  %p3806_p0 = scmp.lt.s32.totalorder %s3260_s19, 4 }
  0x32   : > { %3839 = sst [smem:[#allocation30_spill]] %s3884_s11  ;;  %p84_p13 = por %p3805_p12, %p82_p11 }
  0x33   : > { %s72_s8 = ssub.s32 %s3252_s17, %s3884_s11  ;;  %s3468_s13 = sand.u32 1, %s3260_s19  }
  0x34   : > { %2766 = dma.hbm_to_vmem [thread:$0]  (!%p3432_p9), %s3837_s9, 1024, %s410_s26, [#allocation14], %s3794_s25, %s3794_s25, %s3796_s20  }
  0x35   : > { %p73_p2 = scmp.eq.s32.totalorder %s72_s8, 0  ;;  %s434_s26 = sand.u32 1, %s3240_s15  }
  0x36   : > { %s2369_s30 = sshll.u32 %s3252_s17, 10  ;;  %s2242_s20 = sshll.u32 %s434_s26, 6 }
  0x37   : > { %s3473_s25 = scalar_select %p73_p2, %s3240_s15, %s75_s4  }
  0x38   : > { %s3841_s1 = sld [smem:[#allocation32_spill]]  ;;  %p3480_p3 = pnand %p3806_p0, %p84_p13 }
  0x39   : > { %3840 = sst [smem:[#allocation31_spill]] %s3473_s25  ;;  %s436_s11 = scalar_lea.vmem [#allocation7], %s2242_s20 }
  0x3a   : > { %s443_s23 = sshll.u32 %s436_s11, 4  ;;  %s3484_s22 = sshll.u32 %s434_s26, 5  ;;  %s444_s23 = int_to_ptr.vmem [resolvable:$true] %s443_s23 }
  0x3b   : > { %s433_s8 = scalar_lea.sflag [#allocation8], %s3468_s13  ;;  %p3814_p4 = pneg %p3480_p3 }
  0x3c   : > { %s2997_s4 = scalar_lea.vmem %s444_s23, 1024  ;;  %s3265_s6 = smov [#allocation7]  }
  0x3d   : > { %p2998_p11 = scmp.ne.s32.totalorder %s444_s23, %s2997_s4  ;;  %s3002_s9 = sshll.u32 %s3265_s6, 4  ;;  %s3003_s9 = int_to_ptr.vmem [resolvable:$false] %s3002_s9 }
  0x3e   : > { %s442_s12 = scalar_lea.hbm %s3841_s1, %s2369_s30  ;;  %s3004_s30 = scalar_lea.vmem %s3003_s9, 2048 }
  0x3f   : > { %p3000_p2 = pnand %p2998_p11, %p3814_p4  ;;  %p3005_p13 = scmp.lt.s32.totalorder %s444_s23, %s3003_s9 }
  0x40   : > { %p3006_p0 = scmp.lt.s32.totalorder %s3004_s30, %s2997_s4 }
  0x41   : > { %p3001_p12 = pneg %p3000_p2 }
  0x42   : > { %p3007_p10 = por %p3006_p0, %p3005_p13 }
  0x44   : > { %p3008_p6 = pnand %p3007_p10, %p3001_p12 }
  0x46   : > { %3011 = shalt.err (!%p3008_p6)
}
  0x47   : > { %s3843_s11 = smov 4   ;;  %s3844_s20 = smov 64  }
  0x48   : > { %2770 = dma.hbm_to_vmem [thread:$0]  (!%p3480_p3), %s442_s12, 1024, %s444_s23, %s433_s8, %s3844_s20, %s3844_s20, %s3843_s11  }
  0x49   : > { %s2249_s26 = sshll.u32 %s3252_s17, 7  ;;  %s478_s6 = scalar_lea.vmem [#allocation10], %s3484_s22 }
  0x4a   : > { %s484_s1 = sshll.u32 %s478_s6, 4  ;;  %s483_s30 = scalar_lea.hbm %s3782_s3, %s2249_s26  ;;  %s485_s1 = int_to_ptr.vmem [resolvable:$true] %s484_s1 }
  0x4b   : > { %s3815_s25 = scalar_lea.sflag [#allocation11], %s3468_s13  ;;  %s3025_s15 = scalar_lea.vmem %s485_s1, 512 }
  0x4c   : > { %p3026_p6 = scmp.ne.s32.totalorder %s485_s1, %s3025_s15  ;;  %s3266_s14 = smov [#allocation10]  }
  0x4d   : > { %s3030_s21 = sshll.u32 %s3266_s14, 4  ;;  %s3031_s21 = int_to_ptr.vmem [resolvable:$false] %s3030_s21 }
  0x4e   : > { %p3028_p10 = pnand %p3026_p6, %p3814_p4  ;;  %s3032_s24 = scalar_lea.vmem %s3031_s21, 1024 }
  0x4f   : > { %p3033_p0 = scmp.lt.s32.totalorder %s485_s1, %s3031_s21  ;;  %p3034_p11 = scmp.lt.s32.totalorder %s3032_s24, %s3025_s15 }
  0x50   : > { %p3029_p12 = pneg %p3028_p10 }
  0x51   : > { %p3035_p2 = por %p3034_p11, %p3033_p0 }
  0x53   : > { %p3036_p13 = pnand %p3035_p2, %p3029_p12 }
  0x55   : > { %3039 = shalt.err (!%p3036_p13)
}
  0x56   : > { %s3267_s12 = smov 256   ;;  %s3268_s23 = smov 128  }
  0x57   : > { %s3269_s26 = smov 8   ;;  %s3270_s14 = smov [#allocation5]  }
  0x58   : > { %2776 = dma.hbm_to_vmem [thread:$0]  (!%p3480_p3), %s483_s30, 512, %s485_s1, %s3815_s25, %s3267_s12, %s3268_s23, %s3269_s26  }
  0x59   : > { %s393_s6 = sshll.u32 %s3270_s14, 4  ;;  %s2370_s21 = sshll.u32 %s3252_s17, 9  ;;  %s394_s6 = int_to_ptr.vmem [resolvable:$true] %s393_s6 }
  0x5a   : > { %s3051_s15 = scalar_lea.vmem %s394_s6, 1024  ;;  %p3845_p10 = pneg %p3432_p9 }
  0x5b   : > { %p3052_p6 = scmp.ne.s32.totalorder %s394_s6, %s3051_s15  ;;  %p3059_p11 = scmp.lt.s32.totalorder %s394_s6, %s394_s6 }
  0x5c   : > { %p3060_p2 = scmp.lt.s32.totalorder %s3051_s15, %s3051_s15 }
  0x5d   : > { %p3054_p12 = pnand %p3052_p6, %p3845_p10 }
  0x5e   : > { %p3061_p13 = por %p3060_p2, %p3059_p11 }
  0x5f   : > { %p3055_p0 = pneg %p3054_p12 }
  0x61   : > { %p3062_p4 = pnand %p3061_p13, %p3055_p0 }
  0x63   : > { %3065 = shalt.err (!%p3062_p4)
}
  0x64   : > { %2763 = dma.hbm_to_vmem [thread:$0]  (!%p3432_p9), %s3779_s0, 1024, %s394_s6, [#allocation6], %s3844_s20, %s3844_s20, %s3843_s11  }
  0x65   : > { %s463_s30 = scalar_lea.hbm %s3781_s2, %s2370_s21  ;;  %s457_s12 = scalar_lea.vmem [#allocation9], %s3484_s22 }
  0x66   : > { %s464_s14 = sshll.u32 %s457_s12, 4  ;;  %p3846_p6 = pneg %p3480_p3  ;;  %s465_s14 = int_to_ptr.vmem [resolvable:$true] %s464_s14 }
  0x67   : > { %s3079_s15 = scalar_lea.vmem %s465_s14, 512  ;;  %s3271_s27 = smov [#allocation9]  }
  0x68   : > { %p3080_p4 = scmp.ne.s32.totalorder %s465_s14, %s3079_s15  ;;  %s3084_s25 = sshll.u32 %s3271_s27, 4  ;;  %s3085_s25 = int_to_ptr.vmem [resolvable:$false] %s3084_s25 }
  0x69   : > { %s3086_s1 = scalar_lea.vmem %s3085_s25, 1024  ;;  %p3087_p0 = scmp.lt.s32.totalorder %s465_s14, %s3085_s25 }
  0x6a   : > { %p3082_p10 = pnand %p3080_p4, %p3846_p6  ;;  %p3088_p11 = scmp.lt.s32.totalorder %s3086_s1, %s3079_s15 }
  0x6c   : > { %p3083_p12 = pneg %p3082_p10  ;;  %p3089_p9 = por %p3088_p11, %p3087_p0 }
  0x6e   : > { %p3090_p2 = pnand %p3089_p9, %p3083_p12 }
  0x70   : > { %3093 = shalt.err (!%p3090_p2)
}
  0x71   : > { %2773 = dma.hbm_to_vmem [thread:$0]  (!%p3480_p3), %s463_s30, 512, %s465_s14, %s433_s8, %s3268_s23, %s3268_s23, %s3269_s26  }
  0x72   : > { %s174_s22 = sadd.s32 1, %s3228_s29  ;;  %s47_s25 = sadd.s32 1, %s3256_s18 }
  0x73   : > { %p181_p13 = scmp.ne.s32.totalorder %s3228_s29, %s3224_s28  ;;  %s3886_s25 = smov (!%p3450_p8, %s47_s25), %s3256_s18 }
  0x74   : > { %p3847_p4 = scmp.eq.s32.totalorder %s3260_s19, 0  ;;  %s496_s16 = sand.u32 1, %s3228_s29  }
  0x75   : > { %p49_p10 = scmp.ge.s32.totalorder %s3886_s25, 2  ;;  %s2250_s6 = sshll.u32 %s496_s16, 6 }
  0x76   : > { %p183_p6 = por %p181_p13, %p3847_p4  ;;  %s2371_s21 = sshll.u32 %s3256_s18, 10 }
  0x77   : > { %s3888_s25 = smov (%p49_p10, %s3886_s25), 0  ;;  %s504_s8 = scalar_lea.hbm %s3784_s5, %s2371_s21 }
  0x78   : > { %s498_s23 = scalar_lea.vmem [#allocation12], %s2250_s6  ;;  %s171_s4 = ssub.s32 %s3256_s18, %s3888_s25 }
  0x79   : > { %s505_s26 = sshll.u32 %s498_s23, 4  ;;  %p172_p3 = scmp.eq.s32.totalorder %s171_s4, 0  ;;  %s506_s26 = int_to_ptr.vmem [resolvable:$true] %s505_s26 }
  0x7a   : > { %p3848_p12 = scmp.lt.s32.totalorder %s3260_s19, 4  ;;  %s2253_s30 = sshll.u32 %s496_s16, 7 }
  0x7b   : > { %s3565_s12 = scalar_select %p172_p3, %s3228_s29, %s174_s22  }
  0x7c   : > { %p3560_p8 = pnand %p3848_p12, %p183_p6  ;;  %s3107_s14 = scalar_lea.vmem %s506_s26, 1024 }
  0x7d   : > { %p3108_p11 = scmp.ne.s32.totalorder %s506_s26, %s3107_s14  ;;  %s3272_s15 = smov [#allocation12]  }
  0x7e   : > { %p3096_p0 = pneg %p3560_p8  ;;  %s3112_s27 = sshll.u32 %s3272_s15, 4  ;;  %s3113_s27 = int_to_ptr.vmem [resolvable:$false] %s3112_s27 }
  0x7f   : > { %s3114_s1 = scalar_lea.vmem %s3113_s27, 2048  ;;  %p3115_p13 = scmp.lt.s32.totalorder %s506_s26, %s3113_s27 }
  0x80   : > { %p3110_p9 = pnand %p3108_p11, %p3096_p0  ;;  %p3116_p4 = scmp.lt.s32.totalorder %s3114_s1, %s3107_s14 }
  0x82   : > { %p3111_p2 = pneg %p3110_p9  ;;  %p3117_p6 = por %p3116_p4, %p3115_p13 }
  0x84   : > { %p3118_p10 = pnand %p3117_p6, %p3111_p2 }
  0x86   : > { %3121 = shalt.err (!%p3118_p10)
}
  0x87   : > { %s3850_s22 = scalar_lea.sflag [#allocation11], %s3468_s13  ;;  %s2372_s16 = sshll.u32 %s3256_s18, 11 }
  0x88   : > { %2779 = dma.hbm_to_vmem [thread:$0]  (!%p3560_p8), %s504_s8, 1024, %s506_s26, %s3850_s22, %s3844_s20, %s3844_s20, %s3843_s11  }
  0x89   : > { %s525_s6 = scalar_lea.vmem [#allocation13], %s2253_s30  ;;  %s531_s23 = scalar_lea.hbm %s3786_s7, %s2372_s16 }
  0x8a   : > { %s532_s21 = sshll.u32 %s525_s6, 4  ;;  %s522_s4 = scalar_lea.sflag [#allocation14], %s3468_s13  ;;  %s533_s21 = int_to_ptr.vmem [resolvable:$true] %s532_s21 }
  0x8b   : > { %s3135_s14 = scalar_lea.vmem %s533_s21, 2048  ;;  %s3273_s15 = smov [#allocation13]  }
  0x8c   : > { %p3136_p3 = scmp.ne.s32.totalorder %s533_s21, %s3135_s14  ;;  %s3140_s27 = sshll.u32 %s3273_s15, 4  ;;  %s3141_s27 = int_to_ptr.vmem [resolvable:$false] %s3140_s27 }
  0x8d   : > { %s3142_s1 = scalar_lea.vmem %s3141_s27, 4096  ;;  %p3143_p9 = scmp.lt.s32.totalorder %s533_s21, %s3141_s27 }
  0x8e   : > { %p3138_p12 = pnand %p3136_p3, %p3096_p0  ;;  %p3144_p2 = scmp.lt.s32.totalorder %s3142_s1, %s3135_s14 }
  0x90   : > { %p3139_p11 = pneg %p3138_p12  ;;  %p3145_p13 = por %p3144_p2, %p3143_p9 }
  0x92   : > { %p3146_p4 = pnand %p3145_p13, %p3139_p11 }
  0x94   : > { %3149 = shalt.err (!%p3146_p4)
}
  0x95   : > { %2782 = dma.hbm_to_vmem [thread:$0]  (!%p3560_p8), %s531_s23, 2048, %s533_s21, %s522_s4, %s3844_s20, %s3844_s20, %s3843_s11  }
  0x96   : > { %550 = sbr.rel (%p3424_p7) target bundleno = 1788 (0x6fc), region = 72 }
  0x9b   : > { %3195 = dma.done.wait (%p3405_p1), [#allocation6], 1024  }
  0x9c   : > { %3197 = vsyncadd (%p3405_p1), [#allocation6], 4294966272  ;;  %s3853_s26 = sadd.s32 4294967295, %s3260_s19   ;;  %s3854_s30 = sld [smem:[#allocation22_spill]] }
  0x9d   : > { %s556_s16 = sand.u32 1, %s3853_s26  }
  0x9e   : > { %s557_s24 = scalar_lea.sflag [#allocation8], %s556_s16 }
  0xa2   : > { %s558_s6 = sand.u32 1, %s3854_s30  }
  0xa3   : > { %s2258_s10 = sshll.u32 %s558_s6, 6 }
  0xa4   : > { %s3601_s9 = scalar_lea.vmem [#allocation7], %s2258_s10 }
  0xa5   : > { %3199 = dma.done.wait (%p3414_p5), %s557_s24, 1536  }
  0xa6   : > { %3201 = vsyncadd (%p3414_p5), %s557_s24, 4294965760  ;;  %s2259_s11 = sshll.u32 %s558_s6, 5  ;;  %s575_s21 = scalar_lea.sflag [#allocation11], %s556_s16 }
  0xa7   : > { %s3607_s20 = scalar_lea.vmem [#allocation9], %s2259_s11  ;;  %s3609_s23 = scalar_lea.vmem [#allocation10], %s2259_s11 }
  0xa8   : > { %3203 = dma.done.wait (%p3414_p5), %s575_s21, 512  }
  0xa9   : > { %3205 = vsyncadd (%p3414_p5), %s575_s21, 4294966784  ;;  %s3856_s4 = sld [smem:[#allocation28_spill]]  ;;  %s585_s14 = sand.u32 1, %s3224_s28  }
  0xaa   : > { %s2261_s15 = sshll.u32 %s585_s14, 6 }
  0xab   : > { %s3616_s27 = scalar_lea.vmem [#allocation12], %s2261_s15 }
  0xaf   : > { %p3857_p7 = scmp.ne.s32.totalorder %s3856_s4, 0 }
  0xb1   : > { %3207 = dma.done.wait (%p3857_p7), %s575_s21, 1024  }
  0xb2   : > { %3209 = vsyncadd (%p3857_p7), %s575_s21, 4294966272  ;;  %s2262_s1 = sshll.u32 %s585_s14, 7  ;;  %s593_s13 = scalar_lea.sflag [#allocation14], %s556_s16 }
  0xb3   : > { %s3622_s26 = scalar_lea.vmem [#allocation13], %s2262_s1 }
  0xb4   : > { %3211 = dma.done.wait (%p3857_p7), %s593_s13, 2048  }
  0xb5   : > { %3213 = vsyncadd (%p3857_p7), %s593_s13, 4294965248 }
  0xb6   : > { %3215 = dma.done.wait (%p3405_p1), [#allocation14], 1024  }
  0xb7   : > { %3217 = vsyncadd (%p3405_p1), [#allocation14], 4294966272  ;;  %s3858_s30 = sld [smem:[#allocation25_spill]] }
  0xb8   : > { %s3859_s22 = sld [smem:[#allocation24_spill]] }
  0xb9   : > { %s3860_s10 = sld [smem:[#allocation34_spill]] }
  0xba   : > { %s3861_s8 = sld [smem:[#allocation35_spill]] }
  0xbd   : > { %p666_p5 = scmp.lt.s32.totalorder %s3858_s30, 1  ;;  %p673_p8 = scmp.eq.s32.totalorder %s3858_s30, 0 }
  0xbe   : > { %p674_p0 = scmp.eq.s32.totalorder %s3859_s22, 0 }
  0xbf   : > { %s3890_s30 = smov (!%p666_p5, %s3858_s30), 1 }
  0xc0   : > { %p675_p6 = pnand %p674_p0, %p673_p8  ;;  %s668_s24 = scalar_lea.vmem %s3860_s10, %s3890_s30 }
  0xc1   : > { %s671_s4 = scalar_lea.vmem %s3861_s8, %s3890_s30 }
  0xc2   : > { %678 = sbr.rel (%p675_p6) target bundleno = 210 (0xd2), region = 104 }
  0xc7   : > { %v679_v1 = vld [vmem:[#allocation5] sm:$0xf]  ;;  %v680_v2 = vld [vmem:[#allocation5 + $0x4] sm:$0xf]  ;;  %v681_v3 = vld [vmem:[#allocation5 + $0x8] sm:$0xf] }
  0xc8   : > { %695 = vst [vmem:[#allocation2] sm:$0xf] %v679_v1  ;;  %696 = vst [vmem:[#allocation2 + $0x8] sm:$0xf] %v680_v2  ;;  %v682_v4 = vld [vmem:[#allocation5 + $0xc] sm:$0xf] }
  0xc9   : > { %697 = vst [vmem:[#allocation2 + $0x10] sm:$0xf] %v681_v3  ;;  %v683_v5 = vld [vmem:[#allocation5 + $0x10] sm:$0xf]  ;;  %v684_v6 = vld [vmem:[#allocation5 + $0x14] sm:$0xf] }
  0xca   : > { %698 = vst [vmem:[#allocation2 + $0x18] sm:$0xf] %v682_v4  ;;  %699 = vst [vmem:[#allocation2 + $0x20] sm:$0xf] %v683_v5  ;;  %v685_v7 = vld [vmem:[#allocation5 + $0x18] sm:$0xf] }
  0xcb   : > { %700 = vst [vmem:[#allocation2 + $0x28] sm:$0xf] %v684_v6  ;;  %v686_v8 = vld [vmem:[#allocation5 + $0x1c] sm:$0xf]  ;;  %v687_v9 = vld [vmem:[#allocation5 + $0x20] sm:$0xf] }
  0xcc   : > { %701 = vst [vmem:[#allocation2 + $0x30] sm:$0xf] %v685_v7  ;;  %702 = vst [vmem:[#allocation2 + $0x38] sm:$0xf] %v686_v8  ;;  %v688_v10 = vld [vmem:[#allocation5 + $0x24] sm:$0xf] }
  0xcd   : > { %703 = vst [vmem:[#allocation2 + $0x40] sm:$0xf] %v687_v9  ;;  %v689_v11 = vld [vmem:[#allocation5 + $0x28] sm:$0xf]  ;;  %v690_v12 = vld [vmem:[#allocation5 + $0x2c] sm:$0xf] }
  0xce   : > { %704 = vst [vmem:[#allocation2 + $0x48] sm:$0xf] %v688_v10  ;;  %705 = vst [vmem:[#allocation2 + $0x50] sm:$0xf] %v689_v11  ;;  %v691_v13 = vld [vmem:[#allocation5 + $0x30] sm:$0xf] }
  0xcf   : > { %706 = vst [vmem:[#allocation2 + $0x58] sm:$0xf] %v690_v12  ;;  %v692_v14 = vld [vmem:[#allocation5 + $0x34] sm:$0xf]  ;;  %v693_v15 = vld [vmem:[#allocation5 + $0x38] sm:$0xf] }
  0xd0   : > { %707 = vst [vmem:[#allocation2 + $0x60] sm:$0xf] %v691_v13  ;;  %708 = vst [vmem:[#allocation2 + $0x68] sm:$0xf] %v692_v14  ;;  %v694_v16 = vld [vmem:[#allocation5 + $0x3c] sm:$0xf] }
  0xd1   : > { %709 = vst [vmem:[#allocation2 + $0x70] sm:$0xf] %v693_v15  ;;  %710 = vst [vmem:[#allocation2 + $0x78] sm:$0xf] %v694_v16 }
  0xd2 PF: > { %s3862_s14 = sld [smem:[#allocation24_spill]] }
  0xd8   : > { %p2264_p1 = scmp.ne.s32.totalorder %s3862_s14, 0 }
  0xda   : > { %713 = sbr.rel (%p2264_p1) target bundleno = 232 (0xe8), region = 108 }
  0xdf   : > { %v3274_v17 = vmov 0.0  }
  0xe0   : > { %714 = vst [vmem:[#allocation3 + $0x30] sm:$0xff] %v3274_v17  ;;  %715 = vst [vmem:[#allocation3] sm:$0xff] %v3274_v17 }
  0xe1   : > { %716 = vst [vmem:[#allocation3 + $0x58] sm:$0xff] %v3274_v17  ;;  %717 = vst [vmem:[#allocation3 + $0x18] sm:$0xff] %v3274_v17 }
  0xe2   : > { %718 = vst [vmem:[#allocation3 + $0x50] sm:$0xff] %v3274_v17  ;;  %719 = vst [vmem:[#allocation3 + $0x68] sm:$0xff] %v3274_v17 }
  0xe3   : > { %720 = vst [vmem:[#allocation3 + $0x8] sm:$0xff] %v3274_v17  ;;  %721 = vst [vmem:[#allocation3 + $0x48] sm:$0xff] %v3274_v17 }
  0xe4   : > { %722 = vst [vmem:[#allocation3 + $0x40] sm:$0xff] %v3274_v17  ;;  %723 = vst [vmem:[#allocation3 + $0x20] sm:$0xff] %v3274_v17 }
  0xe5   : > { %724 = vst [vmem:[#allocation3 + $0x10] sm:$0xff] %v3274_v17  ;;  %725 = vst [vmem:[#allocation3 + $0x38] sm:$0xff] %v3274_v17 }
  0xe6   : > { %726 = vst [vmem:[#allocation3 + $0x60] sm:$0xff] %v3274_v17  ;;  %727 = vst [vmem:[#allocation3 + $0x70] sm:$0xff] %v3274_v17 }
  0xe7   : > { %728 = vst [vmem:[#allocation3 + $0x78] sm:$0xff] %v3274_v17  ;;  %729 = vst [vmem:[#allocation3 + $0x28] sm:$0xff] %v3274_v17 }
  0xe8 PF: > { %v2886_v18 = vld [vmem:[#allocation2 + $0x70] ss:$8 sps:$4 sm:$0xff]   ;;  %v2887_v19 = vld [vmem:[#allocation2 + $0x60] ss:$8 sps:$4 sm:$0xff]  }
  0xe9   : > { %2574 = vmatprep.subr.bf16.mxu0 %v2886_v18  ;;  %v2888_v20 = vld [vmem:[#allocation2 + $0x50] ss:$8 sps:$4 sm:$0xff]   ;;  %v2889_v21 = vld [vmem:[#allocation2 + $0x40] ss:$8 sps:$4 sm:$0xff]  }
  0xea   : > { %2575 = vmatpush3.bf16.msra.mxu0 %v2886_v18  ;;  %v746_v22 = vld [vmem:[%s3607_s20] sm:$0xff]  ;;  %v2894_v24 = vld [vmem:[%s3616_s27 + $0x38] sm:$0xff]   ;;  %v2895_v25 = vld [vmem:[%s3616_s27 + $0x30] sm:$0xff]  }
  0xeb   : > { %2576 = vmatprep.subr.bf16.mxu0 %v2887_v19  ;;  %v750_v23 = vunpack.c.l.s8.bf16 %v746_v22  ;;  %v2890_v26 = vld [vmem:[#allocation2 + $0x30] ss:$8 sps:$4 sm:$0xff]   ;;  %2606 = vmatprep.subr.bf16.mxu1 %v2894_v24  ;;  %v2891_v28 = vld [vmem:[#allocation2 + $0x20] ss:$8 sps:$4 sm:$0xff]   ;;  %v751_v34 = vunpack.c.h.s8.bf16 %v746_v22 }
  0xec   : > { %2607 = vmatpush3.bf16.msra.mxu1 %v2894_v24  ;;  %v2896_v27 = vld [vmem:[%s3616_s27 + $0x28] sm:$0xff]   ;;  %v2897_v29 = vld [vmem:[%s3616_s27 + $0x20] sm:$0xff]   ;;  %v2898_v31 = vld [vmem:[%s3616_s27 + $0x18] sm:$0xff]  }
  0xed   : > { %2590 = vmatprep.mubr.bf16.mxu0 %v750_v23  ;;  %2608 = vmatprep.subr.bf16.mxu1 %v2895_v25  ;;  %v2892_v30 = vld [vmem:[#allocation2 + $0x10] ss:$8 sps:$4 sm:$0xff]   ;;  %v2893_v32 = vld [vmem:[#allocation2] ss:$8 sps:$4 sm:$0xff]  }
  0xee   : > { %2577 = vmatpush3.bf16.msra.mxu0 %v2887_v19  ;;  %v747_v33 = vld [vmem:[%s3607_s20 + $0x8] sm:$0xff]  ;;  %v748_v36 = vld [vmem:[%s3607_s20 + $0x10] sm:$0xff]  ;;  %v749_v39 = vld [vmem:[%s3607_s20 + $0x18] sm:$0xff] }
  0xef   : > { %2578 = vmatprep.subr.bf16.mxu0 %v2888_v20  ;;  %v752_v35 = vunpack.c.l.s8.bf16 %v747_v33  ;;  %v753_v37 = vunpack.c.h.s8.bf16 %v747_v33  ;;  %v754_v38 = vunpack.c.l.s8.bf16 %v748_v36  ;;  %v755_v40 = vunpack.c.h.s8.bf16 %v748_v36  ;;  %v2899_v43 = vld [vmem:[%s3616_s27 + $0x10] sm:$0xff]   ;;  %v2900_v44 = vld [vmem:[%s3616_s27 + $0x8] sm:$0xff]   ;;  %v2901_v45 = vld [vmem:[%s3616_s27] sm:$0xff]   ;;  %s3864_s27 = sld [smem:[#allocation24_spill]] }
  0xf0   : > { %2609 = vmatpush3.bf16.msra.mxu1 %v2895_v25  ;;  %v756_v41 = vunpack.c.l.s8.bf16 %v749_v39  ;;  %v757_v42 = vunpack.c.h.s8.bf16 %v749_v39  ;;  %v2406_v47 = vld [vmem:[%s3601_s9] sm:$0xff]   ;;  %v2437_v48 = vld [vmem:[%s3601_s9 + $0x8] sm:$0xff]   ;;  %v2438_v61 = vld [vmem:[%s3601_s9 + $0x10] sm:$0xff]  }
  0xf1   : > { %2610 = vmatprep.subr.bf16.mxu1 %v2896_v27  ;;  %v2412_v50 = vunpack.c.h.bf16 %v2437_v48  ;;  %v2407_v51 = vunpack.c.l.bf16 %v2406_v47  ;;  %v2408_v52 = vunpack.c.h.bf16 %v2406_v47  ;;  %v2411_v53 = vunpack.c.l.bf16 %v2437_v48  ;;  %v2439_v62 = vld [vmem:[%s3601_s9 + $0x18] sm:$0xff]   ;;  %v2440_v13 = vld [vmem:[%s3601_s9 + $0x20] sm:$0xff]   ;;  %v2441_v15 = vld [vmem:[%s3601_s9 + $0x28] sm:$0xff]  }
  0xf2   : > { %2579 = vmatpush3.bf16.msra.mxu0 %v2888_v20  ;;  %v2420_v2 = vunpack.c.h.bf16 %v2439_v62  ;;  %v2415_v3 = vunpack.c.l.bf16 %v2438_v61  ;;  %v2416_v4 = vunpack.c.h.bf16 %v2438_v61  ;;  %v2419_v5 = vunpack.c.l.bf16 %v2439_v62  ;;  %v3671_v47 = vld [vmem:[%s3609_s23 + $0x10] sm:$0xff] }
  0xf3   : > { %2580 = vmatprep.subr.bf16.mxu0 %v2889_v21  ;;  %v2428_v18 = vunpack.c.h.bf16 %v2441_v15  ;;  %v2423_v19 = vunpack.c.l.bf16 %v2440_v13  ;;  %v2424_v20 = vunpack.c.h.bf16 %v2440_v13 }
  0xf4   : > { %2611 = vmatpush3.bf16.msra.mxu1 %v2896_v27 }
  0xf5   : > { %2612 = vmatprep.subr.bf16.mxu1 %v2897_v29  ;;  %p1292_p10 = scmp.eq.s32.totalorder %s3864_s27, 1  ;;  %p2282_p3 = scmp.ne.s32.totalorder %s3864_s27, 1 }
  0xf6   : > { %2581 = vmatpush3.bf16.msra.mxu0 %v2889_v21  ;;  %v2427_v21 = vunpack.c.l.bf16 %v2441_v15 }
  0xf7   : > { %2582 = vmatprep.subr.bf16.mxu0 %v2890_v26 }
  0xf8   : > { %2613 = vmatpush3.bf16.msra.mxu1 %v2897_v29  ;;  %v2442_v29 = vld [vmem:[%s3601_s9 + $0x30] sm:$0xff]  }
  0xf9   : > { %2614 = vmatprep.subr.bf16.mxu1 %v2898_v31  ;;  %v2432_v36 = vunpack.c.h.bf16 %v2442_v29 }
  0xfa   : > { %2583 = vmatpush3.bf16.msra.mxu0 %v2890_v26 }
  0xfb   : > { %2584 = vmatprep.subr.bf16.mxu0 %v2891_v28 }
  0xfc   : > { %2615 = vmatpush3.bf16.msra.mxu1 %v2898_v31  ;;  %v2443_v31 = vld [vmem:[%s3601_s9 + $0x38] sm:$0xff]  }
  0xfd   : > { %2616 = vmatprep.subr.bf16.mxu1 %v2899_v43 }
  0xfe   : > { %2585 = vmatpush3.bf16.msra.mxu0 %v2891_v28 }
  0xff   : > { %2586 = vmatprep.subr.bf16.mxu0 %v2892_v30 }
 0x100   : > { %2617 = vmatpush3.bf16.msra.mxu1 %v2899_v43 }
 0x101   : > { %2618 = vmatprep.subr.bf16.mxu1 %v2900_v44 }
 0x102   : > { %2587 = vmatpush3.bf16.msra.mxu0 %v2892_v30 }
 0x103   : > { %2588 = vmatprep.subr.bf16.mxu0 %v2893_v32 }
 0x104   : > { %2619 = vmatpush3.bf16.msra.mxu1 %v2900_v44 }
 0x105   : > { %2620 = vmatprep.subr.bf16.mxu1 %v2901_v45 }
 0x106   : > { %2589 = vmatpush3.bf16.msra.mxu0 %v2893_v32 }
 0x108   : > { %2621 = vmatpush3.bf16.msra.mxu1 %v2901_v45 }
 0x109   : > { %2591 = vmatmul.mubr.bf16.vlgmr.msra.gmra.mxu0 %v751_v34  ;;  %v2436_v34 = vunpack.c.h.bf16 %v2443_v31 }
 0x10a   : > { %2594 = vmatprep.mubr.bf16.mxu0 %v752_v35  ;;  %v2431_v35 = vunpack.c.l.bf16 %v2442_v29 }
 0x111   : > { %2595 = vmatmul.mubr.bf16.gmra.mxu0 %v753_v37  ;;  %v2435_v37 = vunpack.c.l.bf16 %v2443_v31 }
 0x112   : > { %2598 = vmatprep.mubr.bf16.mxu0 %v754_v38 }
 0x119   : > { %2599 = vmatmul.mubr.bf16.gmra.mxu0 %v755_v40 }
 0x11a   : > { %2602 = vmatprep.mubr.bf16.mxu0 %v756_v41 }
 0x121   : > { %2603 = vmatmul.mubr.bf16.gmra.mxu0 %v757_v42 }
 0x1c9   : > { %v2592_v46 = vpop.f32.mrf.mxu0 }
 0x1ca   : > { %v881_v59 = vadd.f32 %v2592_v46, %v2411_v53  ;;  %v3668_v46 = vld [vmem:[%s3609_s23] sm:$0xff] }
 0x1cb   : > { %v872_v49 = vpop.f32.mrf.mxu0  ;;  %v1131_v48 = vunpack.c.l.s8.bf16 %v3668_v46 }
 0x1cc   : > { %v873_v57 = vadd.f32 %v2407_v51, %v872_v49  ;;  %v1135_v49 = vunpack.c.l.s8.bf16 %v3671_v47 }
 0x1cd   : > { %v2593_v54 = vpop.f32.mrf.mxu0  ;;  %2654 = vmatprep.mubr.bf16.mxu0 %v1131_v48  ;;  %v1136_v48 = vunpack.c.h.s8.bf16 %v3671_v47 }
 0x1ce   : > { %v884_v55 = vadd.f32 %v2593_v54, %v2412_v50 }
 0x1cf   : > { %v875_v56 = vpop.f32.mrf.mxu0 }
 0x1d0   : > { %v876_v58 = vadd.f32 %v2408_v52, %v875_v56  ;;  %v936_v0 = vpack.c.bf16 %v884_v55, %v881_v59 }
 0x1d1   : > { %v2596_v60 = vpop.f32.mrf.mxu0 }
 0x1d2   : > { %v935_v63 = vpack.c.bf16 %v876_v58, %v873_v57  ;;  %v897_v11 = vadd.f32 %v2596_v60, %v2419_v5 }
 0x1d3   : > { %v888_v1 = vpop.f32.mrf.mxu0 }
 0x1d4   : > { %2622 = vmatprep.mubr.bf16.mxu1 %v935_v63  ;;  %v889_v9 = vadd.f32 %v2415_v3, %v888_v1  ;;  %v2273_v63 = vld [vmem:[%s668_s24] ss:$0 sm:$0xff] }
 0x1d5   : > { %v2597_v6 = vpop.f32.mrf.mxu0  ;;  %2623 = vmatmul.mubr.bf16.vlgmr.msra.gmra.mxu1 %v936_v0 }
 0x1d6   : > { %v900_v7 = vadd.f32 %v2597_v6, %v2420_v2 }
 0x1d7   : > { %v891_v8 = vpop.f32.mrf.mxu0 }
 0x1d8   : > { %v892_v10 = vadd.f32 %v2416_v4, %v891_v8  ;;  %v938_v16 = vpack.c.bf16 %v900_v7, %v897_v11 }
 0x1d9   : > { %v2600_v12 = vpop.f32.mrf.mxu0 }
 0x1da   : > { %v937_v14 = vpack.c.bf16 %v892_v10, %v889_v9  ;;  %v913_v27 = vadd.f32 %v2600_v12, %v2427_v21 }
 0x1db   : > { %v904_v17 = vpop.f32.mrf.mxu0 }
 0x1dc   : > { %2626 = vmatprep.mubr.bf16.mxu1 %v937_v14  ;;  %v905_v25 = vadd.f32 %v2423_v19, %v904_v17 }
 0x1dd   : > { %v2601_v22 = vpop.f32.mrf.mxu0  ;;  %2627 = vmatmul.mubr.bf16.gmra.mxu1 %v938_v16 }
 0x1de   : > { %v916_v23 = vadd.f32 %v2601_v22, %v2428_v18 }
 0x1df   : > { %v907_v24 = vpop.f32.mrf.mxu0 }
 0x1e0   : > { %v908_v26 = vadd.f32 %v2424_v20, %v907_v24  ;;  %v940_v32 = vpack.c.bf16 %v916_v23, %v913_v27 }
 0x1e1   : > { %v2604_v28 = vpop.f32.mrf.mxu0 }
 0x1e2   : > { %v939_v30 = vpack.c.bf16 %v908_v26, %v905_v25  ;;  %v929_v43 = vadd.f32 %v2604_v28, %v2435_v37 }
 0x1e3   : > { %v920_v33 = vpop.f32.mrf.mxu0 }
 0x1e4   : > { %2630 = vmatprep.mubr.bf16.mxu1 %v939_v30  ;;  %v921_v41 = vadd.f32 %v2431_v35, %v920_v33 }
 0x1e5   : > { %v2605_v38 = vpop.f32.mrf.mxu0  ;;  %2631 = vmatmul.mubr.bf16.gmra.mxu1 %v940_v32 }
 0x1e6   : > { %v932_v39 = vadd.f32 %v2605_v38, %v2436_v34 }
 0x1e7   : > { %v923_v40 = vpop.f32.mrf.mxu0 }
 0x1e8   : > { %v924_v42 = vadd.f32 %v2432_v36, %v923_v40  ;;  %v942_v45 = vpack.c.bf16 %v932_v39, %v929_v43  ;;  %v1128_v43 = vld [vmem:[%s3609_s23 + $0x8] sm:$0xff] }
 0x1ea   : > { %v941_v44 = vpack.c.bf16 %v924_v42, %v921_v41 }
 0x1ec   : > { %2634 = vmatprep.mubr.bf16.mxu1 %v941_v44  ;;  %v1130_v44 = vld [vmem:[%s3609_s23 + $0x18] sm:$0xff] }
 0x1ed   : > { %2635 = vmatmul.mubr.bf16.gmra.mxu1 %v942_v45  ;;  %v1132_v45 = vunpack.c.h.s8.bf16 %v3668_v46  ;;  %v1139_v46 = vld [vmem:[#allocation3 + $0x30] sm:$0xff] }
 0x1ee   : > { %2662 = vmatprep.mubr.bf16.mxu1 %v1135_v49  ;;  %v1133_v49 = vunpack.c.l.s8.bf16 %v1128_v43 }
 0x295   : > { %v2624_v50 = vpop.f32.mrf.mxu1 }
 0x296   : > { %v1057_v32 = vadd.f32 %v2624_v50, %v2273_v63  ;;  %v1137_v50 = vunpack.c.l.s8.bf16 %v1130_v44 }
 0x297   : > { %v3675_v51 = vpop.f32.mrf.mxu1 }
 0x298   : > { %v1113_v37 = vmax.f32 %v1057_v32, 0.0  ;;  %v1049_v38 = vadd.f32 %v2273_v63, %v3675_v51  ;;  %v1134_v51 = vunpack.c.h.s8.bf16 %v1128_v43 }
 0x299   : > { %v2625_v52 = vpop.f32.mrf.mxu1 }
 0x29a   : > { %v1060_v29 = vadd.f32 %v2625_v52, %v2273_v63  ;;  %v1111_v41 = vmax.f32 %v1049_v38, 0.0  ;;  %v1138_v52 = vunpack.c.h.s8.bf16 %v1130_v44 }
 0x29b   : > { %v3677_v53 = vpop.f32.mrf.mxu1 }
 0x29c   : > { %v1114_v34 = vmax.f32 %v1060_v29, 0.0  ;;  %v1052_v35 = vadd.f32 %v2273_v63, %v3677_v53  ;;  %v1141_v53 = vld [vmem:[#allocation3 + $0x58] sm:$0xff] }
 0x29d   : > { %v2628_v54 = vpop.f32.mrf.mxu1 }
 0x29e   : > { %v1073_v22 = vadd.f32 %v2628_v54, %v2273_v63  ;;  %v1156_v39 = vpack.c.bf16 %v1114_v34, %v1113_v37  ;;  %v1112_v40 = vmax.f32 %v1052_v35, 0.0  ;;  %v1149_v54 = vld [vmem:[#allocation3 + $0x10] sm:$0xff] }
 0x29f   : > { %v1064_v55 = vpop.f32.mrf.mxu1 }
 0x2a0   : > { %v1117_v27 = vmax.f32 %v1073_v22, 0.0  ;;  %v1065_v28 = vadd.f32 %v2273_v63, %v1064_v55  ;;  %v1155_v42 = vpack.c.bf16 %v1112_v40, %v1111_v41  ;;  %v1154_v22 = vld [vmem:[#allocation3 + $0x28] sm:$0xff] }
 0x2a1   : > { %v2629_v56 = vpop.f32.mrf.mxu1 }
 0x2a2   : > { %v1076_v19 = vadd.f32 %v2629_v56, %v2273_v63  ;;  %v1115_v33 = vmax.f32 %v1065_v28, 0.0  ;;  %v1152_v28 = vld [vmem:[#allocation3 + $0x70] sm:$0xff] }
 0x2a3   : > { %v1067_v57 = vpop.f32.mrf.mxu1 }
 0x2a4   : > { %v1118_v24 = vmax.f32 %v1076_v19, 0.0  ;;  %v1068_v25 = vadd.f32 %v2273_v63, %v1067_v57  ;;  %v1147_v57 = vld [vmem:[#allocation3 + $0x40] sm:$0xff] }
 0x2a5   : > { %v2632_v58 = vpop.f32.mrf.mxu1 }
 0x2a6   : > { %v1089_v10 = vadd.f32 %v2632_v58, %v2273_v63  ;;  %v1158_v30 = vpack.c.bf16 %v1118_v24, %v1117_v27  ;;  %v1116_v31 = vmax.f32 %v1068_v25, 0.0  ;;  %v1144_v27 = vld [vmem:[#allocation3 + $0x68] sm:$0xff] }
 0x2a7   : > { %v1080_v59 = vpop.f32.mrf.mxu1 }
 0x2a8   : > { %v1121_v17 = vmax.f32 %v1089_v10, 0.0  ;;  %v1081_v18 = vadd.f32 %v2273_v63, %v1080_v59  ;;  %v1157_v36 = vpack.c.bf16 %v1116_v31, %v1115_v33  ;;  %v1153_v10 = vld [vmem:[#allocation3 + $0x78] sm:$0xff] }
 0x2a9   : > { %v2633_v60 = vpop.f32.mrf.mxu1 }
 0x2aa   : > { %v1092_v6 = vadd.f32 %v2633_v60, %v2273_v63  ;;  %v1119_v23 = vmax.f32 %v1081_v18, 0.0 }
 0x2ab   : > { %v1083_v61 = vpop.f32.mrf.mxu1 }
 0x2ac   : > { %v1122_v14 = vmax.f32 %v1092_v6, 0.0  ;;  %v1084_v15 = vadd.f32 %v2273_v63, %v1083_v61  ;;  %v1142_v61 = vld [vmem:[#allocation3 + $0x18] sm:$0xff] }
 0x2ad   : > { %v2636_v62 = vpop.f32.mrf.mxu1 }
 0x2ae   : > { %v1105_v1 = vadd.f32 %v2636_v62, %v2273_v63  ;;  %v1160_v20 = vpack.c.bf16 %v1122_v14, %v1121_v17  ;;  %v1120_v21 = vmax.f32 %v1084_v15, 0.0  ;;  %v1150_v62 = vld [vmem:[#allocation3 + $0x38] sm:$0xff]  ;;  %v1143_v15 = vld [vmem:[#allocation3 + $0x50] sm:$0xff] }
 0x2af   : > { %v1096_v0 = vpop.f32.mrf.mxu1 }
 0x2b0   : > { %v1097_v3 = vadd.f32 %v2273_v63, %v1096_v0  ;;  %v1125_v7 = vmax.f32 %v1105_v1, 0.0  ;;  %v1159_v26 = vpack.c.bf16 %v1120_v21, %v1119_v23  ;;  %v1146_v21 = vld [vmem:[#allocation3 + $0x48] sm:$0xff] }
 0x2b1   : > { %v2637_v2 = vpop.f32.mrf.mxu1 }
 0x2b2   : > { %v1108_v4 = vadd.f32 %v2637_v2, %v2273_v63  ;;  %v1123_v11 = vmax.f32 %v1097_v3, 0.0  ;;  %v1140_v3 = vld [vmem:[#allocation3] sm:$0xff] }
 0x2b3   : > { %v1099_v5 = vpop.f32.mrf.mxu1 }
 0x2b4   : > { %v1126_v8 = vmax.f32 %v1108_v4, 0.0  ;;  %v1100_v9 = vadd.f32 %v2273_v63, %v1099_v5  ;;  %v1148_v4 = vld [vmem:[#allocation3 + $0x20] sm:$0xff] }
 0x2b6   : > { %v1162_v12 = vpack.c.bf16 %v1126_v8, %v1125_v7  ;;  %v1124_v13 = vmax.f32 %v1100_v9, 0.0  ;;  %v1145_v9 = vld [vmem:[#allocation3 + $0x8] sm:$0xff] }
 0x2b8   : > { %v1161_v16 = vpack.c.bf16 %v1124_v13, %v1123_v11  ;;  %2638 = vmatprep.subr.bf16.mxu0 %v1162_v12  ;;  %2710 = vmatprep.subr.bf16.mxu1 %v1162_v12 }
 0x2b9   : > { %2639 = vmatpush3.bf16.msra.mxu0 %v1162_v12  ;;  %2718 = vmatpush3.bf16.msra.mxu1 %v1162_v12 }
 0x2ba   : > { %2640 = vmatprep.subr.bf16.mxu0 %v1161_v16  ;;  %2711 = vmatprep.subr.bf16.mxu1 %v1161_v16 }
 0x2bd   : > { %2641 = vmatpush3.bf16.msra.mxu0 %v1161_v16  ;;  %2719 = vmatpush3.bf16.msra.mxu1 %v1161_v16  ;;  %v1151_v16 = vld [vmem:[#allocation3 + $0x60] sm:$0xff] }
 0x2be   : > { %2642 = vmatprep.subr.bf16.mxu0 %v1160_v20  ;;  %2712 = vmatprep.subr.bf16.mxu1 %v1160_v20 }
 0x2c1   : > { %2643 = vmatpush3.bf16.msra.mxu0 %v1160_v20  ;;  %2720 = vmatpush3.bf16.msra.mxu1 %v1160_v20 }
 0x2c2   : > { %2644 = vmatprep.subr.bf16.mxu0 %v1159_v26  ;;  %2713 = vmatprep.subr.bf16.mxu1 %v1159_v26 }
 0x2c5   : > { %2645 = vmatpush3.bf16.msra.mxu0 %v1159_v26  ;;  %2721 = vmatpush3.bf16.msra.mxu1 %v1159_v26 }
 0x2c6   : > { %2646 = vmatprep.subr.bf16.mxu0 %v1158_v30  ;;  %2714 = vmatprep.subr.bf16.mxu1 %v1158_v30 }
 0x2c9   : > { %2647 = vmatpush3.bf16.msra.mxu0 %v1158_v30  ;;  %2722 = vmatpush3.bf16.msra.mxu1 %v1158_v30 }
 0x2ca   : > { %2648 = vmatprep.subr.bf16.mxu0 %v1157_v36  ;;  %2715 = vmatprep.subr.bf16.mxu1 %v1157_v36 }
 0x2cd   : > { %2649 = vmatpush3.bf16.msra.mxu0 %v1157_v36  ;;  %2723 = vmatpush3.bf16.msra.mxu1 %v1157_v36 }
 0x2ce   : > { %2650 = vmatprep.subr.bf16.mxu0 %v1156_v39  ;;  %2716 = vmatprep.subr.bf16.mxu1 %v1156_v39 }
 0x2d1   : > { %2651 = vmatpush3.bf16.msra.mxu0 %v1156_v39  ;;  %2724 = vmatpush3.bf16.msra.mxu1 %v1156_v39 }
 0x2d2   : > { %2652 = vmatprep.subr.bf16.mxu0 %v1155_v42  ;;  %2717 = vmatprep.subr.bf16.mxu1 %v1155_v42 }
 0x2d5   : > { %2653 = vmatpush3.bf16.msra.mxu0 %v1155_v42  ;;  %2725 = vmatpush3.bf16.msra.mxu1 %v1155_v42 }
 0x2d8   : > { %2655 = vmatmul.mubr.bf16.vlgmr.msra.gmra.mxu0 %v1132_v45  ;;  %2663 = vmatmul.mubr.bf16.vlgmr.msra.gmra.mxu1 %v1136_v48 }
 0x2d9   : > { %2658 = vmatprep.mubr.bf16.mxu0 %v1133_v49  ;;  %2666 = vmatprep.mubr.bf16.mxu1 %v1137_v50 }
 0x2e0   : > { %2659 = vmatmul.mubr.bf16.gmra.mxu0 %v1134_v51  ;;  %2667 = vmatmul.mubr.bf16.gmra.mxu1 %v1138_v52 }
 0x398   : > { %v2656_v55 = vpop.f32.mrf.mxu0  ;;  %v2664_v56 = vpop.f32.mrf.mxu1 }
 0x399   : > { %v1262_v47 = vadd.f32 %v2656_v55, %v1141_v53  ;;  %v1270_v58 = vadd.f32 %v2664_v56, %v1149_v54 }
 0x39a   : > { %v1197_v59 = vpop.f32.mrf.mxu0  ;;  %v1229_v60 = vpop.f32.mrf.mxu1 }
 0x39b   : > { %1278 = vst [vmem:[#allocation3 + $0x58] sm:$0xff] %v1262_v47  ;;  %1286 = vst [vmem:[#allocation3 + $0x10] sm:$0xff] %v1270_v58  ;;  %v1260_v63 = vadd.f32 %v1197_v59, %v1139_v46  ;;  %v1268_v0 = vadd.f32 %v1229_v60, %v1147_v57 }
 0x39c   : > { %v2657_v1 = vpop.f32.mrf.mxu0  ;;  %v2665_v2 = vpop.f32.mrf.mxu1 }
 0x39d   : > { %1276 = vst [vmem:[#allocation3 + $0x30] sm:$0xff] %v1260_v63  ;;  %1284 = vst [vmem:[#allocation3 + $0x40] sm:$0xff] %v1268_v0  ;;  %v1263_v5 = vadd.f32 %v2657_v1, %v1142_v61  ;;  %v1271_v6 = vadd.f32 %v2665_v2, %v1150_v62 }
 0x39e   : > { %v1200_v7 = vpop.f32.mrf.mxu0  ;;  %v1232_v8 = vpop.f32.mrf.mxu1 }
 0x39f   : > { %1279 = vst [vmem:[#allocation3 + $0x18] sm:$0xff] %v1263_v5  ;;  %1287 = vst [vmem:[#allocation3 + $0x38] sm:$0xff] %v1271_v6  ;;  %v1261_v11 = vadd.f32 %v1200_v7, %v1140_v3  ;;  %v1269_v12 = vadd.f32 %v1232_v8, %v1148_v4 }
 0x3a0   : > { %v2660_v13 = vpop.f32.mrf.mxu0  ;;  %v2668_v14 = vpop.f32.mrf.mxu1 }
 0x3a1   : > { %1277 = vst [vmem:[#allocation3] sm:$0xff] %v1261_v11  ;;  %1285 = vst [vmem:[#allocation3 + $0x20] sm:$0xff] %v1269_v12  ;;  %v1266_v17 = vadd.f32 %v2660_v13, %v1145_v9  ;;  %v1274_v18 = vadd.f32 %v2668_v14, %v1153_v10 }
 0x3a2   : > { %v1213_v19 = vpop.f32.mrf.mxu0  ;;  %v1245_v20 = vpop.f32.mrf.mxu1 }
 0x3a3   : > { %1282 = vst [vmem:[#allocation3 + $0x8] sm:$0xff] %v1266_v17  ;;  %1290 = vst [vmem:[#allocation3 + $0x78] sm:$0xff] %v1274_v18  ;;  %v1264_v23 = vadd.f32 %v1213_v19, %v1143_v15  ;;  %v1272_v24 = vadd.f32 %v1245_v20, %v1151_v16 }
 0x3a4   : > { %v2661_v25 = vpop.f32.mrf.mxu0  ;;  %v2669_v26 = vpop.f32.mrf.mxu1 }
 0x3a5   : > { %1280 = vst [vmem:[#allocation3 + $0x50] sm:$0xff] %v1264_v23  ;;  %1288 = vst [vmem:[#allocation3 + $0x60] sm:$0xff] %v1272_v24  ;;  %v1267_v29 = vadd.f32 %v2661_v25, %v1146_v21  ;;  %v1275_v30 = vadd.f32 %v2669_v26, %v1154_v22  ;;  %1295 = sbr.rel (%p2282_p3) target bundleno = 1203 (0x4b3), region = 112 }
 0x3a6   : > { %v1216_v31 = vpop.f32.mrf.mxu0  ;;  %v1248_v32 = vpop.f32.mrf.mxu1 }
 0x3a7   : > { %1283 = vst [vmem:[#allocation3 + $0x48] sm:$0xff] %v1267_v29  ;;  %1291 = vst [vmem:[#allocation3 + $0x28] sm:$0xff] %v1275_v30  ;;  %v1265_v33 = vadd.f32 %v1216_v31, %v1144_v27  ;;  %v1273_v34 = vadd.f32 %v1248_v32, %v1152_v28 }
 0x3a9   : > { %1281 = vst [vmem:[#allocation3 + $0x68] sm:$0xff] %v1265_v33  ;;  %1289 = vst [vmem:[#allocation3 + $0x70] sm:$0xff] %v1273_v34 }
 0x3aa   : > { %v2902_v35 = vld [vmem:[%s3622_s26 + $0x78] sm:$0xff]   ;;  %v2904_v37 = vld [vmem:[%s3622_s26 + $0x70] sm:$0xff]   ;;  %v2906_v39 = vld [vmem:[%s3622_s26 + $0x68] sm:$0xff]  }
 0x3ab   : > { %v2903_v36 = vld [vmem:[%s3622_s26 + $0x38] sm:$0xff]   ;;  %2492 = vmatprep.subr.bf16.mxu0 %v2902_v35  ;;  %2726 = vmatprep.subr.bf16.mxu1 %v2902_v35  ;;  %v2905_v38 = vld [vmem:[%s3622_s26 + $0x30] sm:$0xff]   ;;  %v2907_v40 = vld [vmem:[%s3622_s26 + $0x28] sm:$0xff]  }
 0x3ac   : > { %2493 = vmatpush3.bf16.msra.mxu0 %v2903_v36  ;;  %2734 = vmatpush3.bf16.msra.mxu1 %v2903_v36  ;;  %v2908_v41 = vld [vmem:[%s3622_s26 + $0x60] sm:$0xff]   ;;  %v2910_v43 = vld [vmem:[%s3622_s26 + $0x58] sm:$0xff]   ;;  %v2912_v45 = vld [vmem:[%s3622_s26 + $0x50] sm:$0xff]  }
 0x3ad   : > { %2494 = vmatprep.subr.bf16.mxu0 %v2904_v37  ;;  %2727 = vmatprep.subr.bf16.mxu1 %v2904_v37  ;;  %v2909_v42 = vld [vmem:[%s3622_s26 + $0x20] sm:$0xff]   ;;  %v2911_v44 = vld [vmem:[%s3622_s26 + $0x18] sm:$0xff]   ;;  %v1296_v48 = vld [vmem:[#allocation3 + $0x30] sm:$0xff] }
 0x3ae   : > { %v1297_v49 = vld [vmem:[#allocation3] sm:$0xff]  ;;  %v2913_v51 = vld [vmem:[%s3622_s26 + $0x10] sm:$0xff]   ;;  %v2373_v52 = vpack.c.bf16 %v1296_v48, %v1296_v48  ;;  %v2914_v57 = vld [vmem:[%s3622_s26 + $0x48] sm:$0xff]  }
 0x3af   : > { %v1304_v50 = vld [vmem:[#allocation3 + $0x40] sm:$0xff]  ;;  %v2374_v53 = vpack.c.bf16 %v1297_v49, %v1297_v49  ;;  %v1298_v56 = vld [vmem:[#allocation3 + $0x58] sm:$0xff]  ;;  %v1306_v60 = vld [vmem:[#allocation3 + $0x10] sm:$0xff] }
 0x3b0   : > { %2495 = vmatpush3.bf16.msra.mxu0 %v2905_v38  ;;  %2735 = vmatpush3.bf16.msra.mxu1 %v2905_v38  ;;  %v1305_v54 = vld [vmem:[#allocation3 + $0x20] sm:$0xff]  ;;  %v2381_v55 = vpack.c.bf16 %v1304_v50, %v1304_v50  ;;  %v1299_v46 = vld [vmem:[#allocation3 + $0x18] sm:$0xff]  ;;  %v2375_v58 = vpack.c.bf16 %v1298_v56, %v1298_v56  ;;  %v1300_v62 = vld [vmem:[#allocation3 + $0x50] sm:$0xff]  ;;  %1376 = vst [vmem:[#allocation2 + $0x4] sm:$0xf] %v2373_v52 }
 0x3b1   : > { %2496 = vmatprep.subr.bf16.mxu0 %v2906_v39  ;;  %2728 = vmatprep.subr.bf16.mxu1 %v2906_v39  ;;  %v2382_v47 = vpack.c.bf16 %v1305_v54, %v1305_v54  ;;  %v2376_v59 = vpack.c.bf16 %v1299_v46, %v1299_v46  ;;  %v1307_v61 = vld [vmem:[#allocation3 + $0x38] sm:$0xff]  ;;  %1377 = vst [vmem:[#allocation2 + $0xc] sm:$0xf] %v2374_v53  ;;  %v1301_v1 = vld [vmem:[#allocation3 + $0x68] sm:$0xff]  ;;  %v1308_v3 = vld [vmem:[#allocation3 + $0x60] sm:$0xff] }
 0x3b2   : > { %1384 = vst [vmem:[#allocation2 + $0x44] sm:$0xf] %v2381_v55  ;;  %v2383_v63 = vpack.c.bf16 %v1306_v60, %v1306_v60  ;;  %v2384_v0 = vpack.c.bf16 %v1307_v61, %v1307_v61  ;;  %v2377_v2 = vpack.c.bf16 %v1300_v62, %v1300_v62  ;;  %v1309_v4 = vld [vmem:[#allocation3 + $0x70] sm:$0xff]  ;;  %1378 = vst [vmem:[#allocation2 + $0x14] sm:$0xf] %v2375_v58  ;;  %v1302_v8 = vld [vmem:[#allocation3 + $0x8] sm:$0xff] }
 0x3b3   : > { %1385 = vst [vmem:[#allocation2 + $0x4c] sm:$0xf] %v2382_v47  ;;  %1379 = vst [vmem:[#allocation2 + $0x1c] sm:$0xf] %v2376_v59  ;;  %v2378_v5 = vpack.c.bf16 %v1301_v1, %v1301_v1  ;;  %v2385_v6 = vpack.c.bf16 %v1308_v3, %v1308_v3  ;;  %v2386_v7 = vpack.c.bf16 %v1309_v4, %v1309_v4  ;;  %v1303_v9 = vld [vmem:[#allocation3 + $0x48] sm:$0xff]  ;;  %v1310_v10 = vld [vmem:[#allocation3 + $0x78] sm:$0xff] }
 0x3b4   : > { %2497 = vmatpush3.bf16.msra.mxu0 %v2907_v40  ;;  %2736 = vmatpush3.bf16.msra.mxu1 %v2907_v40  ;;  %1386 = vst [vmem:[#allocation2 + $0x54] sm:$0xf] %v2383_v63  ;;  %1387 = vst [vmem:[#allocation2 + $0x5c] sm:$0xf] %v2384_v0  ;;  %v2379_v11 = vpack.c.bf16 %v1302_v8, %v1302_v8  ;;  %v2380_v12 = vpack.c.bf16 %v1303_v9, %v1303_v9  ;;  %v1311_v13 = vld [vmem:[#allocation3 + $0x28] sm:$0xff] }
 0x3b5   : > { %2498 = vmatprep.subr.bf16.mxu0 %v2908_v41  ;;  %2729 = vmatprep.subr.bf16.mxu1 %v2908_v41  ;;  %1380 = vst [vmem:[#allocation2 + $0x24] sm:$0xf] %v2377_v2  ;;  %v2387_v14 = vpack.c.bf16 %v1310_v10, %v1310_v10  ;;  %1381 = vst [vmem:[#allocation2 + $0x2c] sm:$0xf] %v2378_v5  ;;  %v2388_v15 = vpack.c.bf16 %v1311_v13, %v1311_v13  ;;  %v2915_v16 = vld [vmem:[%s3622_s26 + $0x8] sm:$0xff]   ;;  %v2916_v17 = vld [vmem:[%s3622_s26 + $0x40] sm:$0xff]  }
 0x3b6   : > { %1388 = vst [vmem:[#allocation2 + $0x64] sm:$0xf] %v2385_v6  ;;  %1389 = vst [vmem:[#allocation2 + $0x6c] sm:$0xf] %v2386_v7  ;;  %v2917_v18 = vld [vmem:[%s3622_s26] sm:$0xff]  }
 0x3b7   : > { %1382 = vst [vmem:[#allocation2 + $0x34] sm:$0xf] %v2379_v11  ;;  %1383 = vst [vmem:[#allocation2 + $0x3c] sm:$0xf] %v2380_v12  ;;  %v2922_v21 = vld [vmem:[#allocation2] ss:$8 sps:$4 sm:$0xff]  }
 0x3b8   : > { %2499 = vmatpush3.bf16.msra.mxu0 %v2909_v42  ;;  %2737 = vmatpush3.bf16.msra.mxu1 %v2909_v42  ;;  %1390 = vst [vmem:[#allocation2 + $0x74] sm:$0xf] %v2387_v14  ;;  %1391 = vst [vmem:[#allocation2 + $0x7c] sm:$0xf] %v2388_v15  ;;  %v2918_v19 = vld [vmem:[#allocation2 + $0x4] ss:$8 sps:$4 sm:$0xff]  }
 0x3b9   : > { %2500 = vmatprep.subr.bf16.mxu0 %v2910_v43  ;;  %2730 = vmatprep.subr.bf16.mxu1 %v2910_v43  ;;  %v2923_v22 = vld [vmem:[#allocation2 + $0x40] ss:$8 sps:$4 sm:$0xff]   ;;  %v2928_v25 = vld [vmem:[#allocation2 + $0x10] ss:$8 sps:$4 sm:$0xff]  }
 0x3ba   : > { %v2920_v20 = vld [vmem:[#allocation2 + $0x44] ss:$8 sps:$4 sm:$0xff]   ;;  %1655 = vmatprep.mubr.bf16.mxu0 %v2918_v19  ;;  %v2924_v23 = vld [vmem:[#allocation2 + $0x14] ss:$8 sps:$4 sm:$0xff]   ;;  %v2929_v26 = vld [vmem:[#allocation2 + $0x50] ss:$8 sps:$4 sm:$0xff]  }
 0x3bb   : > { %1687 = vmatprep.mubr.bf16.mxu1 %v2920_v20  ;;  %v2926_v24 = vld [vmem:[#allocation2 + $0x54] ss:$8 sps:$4 sm:$0xff]   ;;  %v2934_v29 = vld [vmem:[#allocation2 + $0x20] ss:$8 sps:$4 sm:$0xff]   ;;  %v2940_v33 = vld [vmem:[#allocation2 + $0x30] ss:$8 sps:$4 sm:$0xff]  }
 0x3bc   : > { %2501 = vmatpush3.bf16.msra.mxu0 %v2911_v44  ;;  %2738 = vmatpush3.bf16.msra.mxu1 %v2911_v44  ;;  %v2930_v27 = vld [vmem:[#allocation2 + $0x24] ss:$8 sps:$4 sm:$0xff]   ;;  %v2935_v30 = vld [vmem:[#allocation2 + $0x60] ss:$8 sps:$4 sm:$0xff]   ;;  %v2941_v34 = vld [vmem:[#allocation2 + $0x70] ss:$8 sps:$4 sm:$0xff]  }
 0x3bd   : > { %2502 = vmatprep.subr.bf16.mxu0 %v2912_v45  ;;  %2731 = vmatprep.subr.bf16.mxu1 %v2912_v45  ;;  %v2932_v28 = vld [vmem:[#allocation2 + $0x64] ss:$8 sps:$4 sm:$0xff]   ;;  %v3713_v37 = vld [vmem:[%s671_s4] ss:$0 sm:$0xff] }
 0x3be   : > { %v2936_v31 = vld [vmem:[#allocation2 + $0x34] ss:$8 sps:$4 sm:$0xff]  }
 0x3bf   : > { %v2938_v32 = vld [vmem:[#allocation2 + $0x74] ss:$8 sps:$4 sm:$0xff]  }
 0x3c0   : > { %2503 = vmatpush3.bf16.msra.mxu0 %v2913_v51  ;;  %2739 = vmatpush3.bf16.msra.mxu1 %v2913_v51 }
 0x3c1   : > { %2504 = vmatprep.subr.bf16.mxu0 %v2914_v57  ;;  %2732 = vmatprep.subr.bf16.mxu1 %v2914_v57 }
 0x3c4   : > { %2505 = vmatpush3.bf16.msra.mxu0 %v2915_v16  ;;  %2740 = vmatpush3.bf16.msra.mxu1 %v2915_v16 }
 0x3c5   : > { %2506 = vmatprep.subr.bf16.mxu0 %v2916_v17  ;;  %2733 = vmatprep.subr.bf16.mxu1 %v2916_v17 }
 0x3c8   : > { %2507 = vmatpush3.bf16.msra.mxu0 %v2917_v18  ;;  %2741 = vmatpush3.bf16.msra.mxu1 %v2917_v18 }
 0x3cb   : > { %1656 = vmatmul.mubr.bf16.vlgmr.msra.gmra.mxu0 %v2922_v21  ;;  %1688 = vmatmul.mubr.bf16.vlgmr.msra.gmra.mxu1 %v2923_v22 }
 0x3cc   : > { %1663 = vmatprep.mubr.bf16.mxu0 %v2924_v23  ;;  %1695 = vmatprep.mubr.bf16.mxu1 %v2926_v24 }
 0x3d3   : > { %1664 = vmatmul.mubr.bf16.gmra.mxu0 %v2928_v25  ;;  %1696 = vmatmul.mubr.bf16.gmra.mxu1 %v2929_v26 }
 0x3d4   : > { %1671 = vmatprep.mubr.bf16.mxu0 %v2930_v27  ;;  %1703 = vmatprep.mubr.bf16.mxu1 %v2932_v28 }
 0x3db   : > { %1672 = vmatmul.mubr.bf16.gmra.mxu0 %v2934_v29  ;;  %1704 = vmatmul.mubr.bf16.gmra.mxu1 %v2935_v30 }
 0x3dc   : > { %1679 = vmatprep.mubr.bf16.mxu0 %v2936_v31  ;;  %1711 = vmatprep.mubr.bf16.mxu1 %v2938_v32 }
 0x3e3   : > { %1680 = vmatmul.mubr.bf16.gmra.mxu0 %v2940_v33  ;;  %1712 = vmatmul.mubr.bf16.gmra.mxu1 %v2941_v34 }
 0x48b   : > { %v2508_v35 = vpop.f32.mrf.mxu0  ;;  %v2532_v36 = vpop.f32.mrf.mxu1 }
 0x48d   : > { %v2509_v38 = vpop.f32.mrf.mxu0  ;;  %v2533_v39 = vpop.f32.mrf.mxu1 }
 0x48e   : > { %v2510_v40 = vadd.f32 %v2509_v38, %v2508_v35  ;;  %v2534_v41 = vadd.f32 %v2533_v39, %v2532_v36 }
 0x48f   : > { %v2511_v42 = vpop.f32.mrf.mxu0  ;;  %v2535_v43 = vpop.f32.mrf.mxu1 }
 0x490   : > { %v1658_v44 = vadd.f32 %v2510_v40, %v3713_v37  ;;  %v1690_v45 = vadd.f32 %v2534_v41, %v3713_v37 }
 0x491   : > { %v2512_v48 = vpop.f32.mrf.mxu0  ;;  %v2536_v49 = vpop.f32.mrf.mxu1 }
 0x492   : > { %v1720_v50 = vmax.f32 %v1658_v44, 0.0  ;;  %v1728_v51 = vmax.f32 %v1690_v45, 0.0  ;;  %v2513_v52 = vadd.f32 %v2512_v48, %v2511_v42  ;;  %v2537_v53 = vadd.f32 %v2536_v49, %v2535_v43 }
 0x493   : > { %v2514_v54 = vpop.f32.mrf.mxu0  ;;  %v2538_v55 = vpop.f32.mrf.mxu1 }
 0x494   : > { %v2389_v56 = vpack.c.bf16 %v1720_v50, %v1720_v50  ;;  %v2397_v46 = vpack.c.bf16 %v1728_v51, %v1728_v51  ;;  %v1661_v57 = vadd.f32 %v2513_v52, %v3713_v37  ;;  %v1693_v47 = vadd.f32 %v2537_v53, %v3713_v37 }
 0x495   : > { %v2515_v58 = vpop.f32.mrf.mxu0  ;;  %v2539_v59 = vpop.f32.mrf.mxu1 }
 0x496   : > { %1800 = vst [vmem:[#allocation2] sm:$0xf] %v2389_v56  ;;  %1808 = vst [vmem:[#allocation2 + $0x40] sm:$0xf] %v2397_v46  ;;  %v1721_v60 = vmax.f32 %v1661_v57, 0.0  ;;  %v1729_v61 = vmax.f32 %v1693_v47, 0.0  ;;  %v2516_v62 = vadd.f32 %v2515_v58, %v2514_v54  ;;  %v2540_v63 = vadd.f32 %v2539_v59, %v2538_v55 }
 0x497   : > { %v2517_v0 = vpop.f32.mrf.mxu0  ;;  %v2541_v1 = vpop.f32.mrf.mxu1 }
 0x498   : > { %v2390_v2 = vpack.c.bf16 %v1721_v60, %v1721_v60  ;;  %v2398_v3 = vpack.c.bf16 %v1729_v61, %v1729_v61  ;;  %v1666_v4 = vadd.f32 %v2516_v62, %v3713_v37  ;;  %v1698_v5 = vadd.f32 %v2540_v63, %v3713_v37 }
 0x499   : > { %v2518_v6 = vpop.f32.mrf.mxu0  ;;  %v2542_v7 = vpop.f32.mrf.mxu1 }
 0x49a   : > { %1801 = vst [vmem:[#allocation2 + $0x8] sm:$0xf] %v2390_v2  ;;  %1809 = vst [vmem:[#allocation2 + $0x48] sm:$0xf] %v2398_v3  ;;  %v1722_v8 = vmax.f32 %v1666_v4, 0.0  ;;  %v1730_v9 = vmax.f32 %v1698_v5, 0.0  ;;  %v2519_v10 = vadd.f32 %v2518_v6, %v2517_v0  ;;  %v2543_v11 = vadd.f32 %v2542_v7, %v2541_v1 }
 0x49b   : > { %v2520_v12 = vpop.f32.mrf.mxu0  ;;  %v2544_v13 = vpop.f32.mrf.mxu1 }
 0x49c   : > { %v2391_v14 = vpack.c.bf16 %v1722_v8, %v1722_v8  ;;  %v2399_v15 = vpack.c.bf16 %v1730_v9, %v1730_v9  ;;  %v1669_v16 = vadd.f32 %v2519_v10, %v3713_v37  ;;  %v1701_v17 = vadd.f32 %v2543_v11, %v3713_v37 }
 0x49d   : > { %v2521_v18 = vpop.f32.mrf.mxu0  ;;  %v2545_v19 = vpop.f32.mrf.mxu1 }
 0x49e   : > { %1802 = vst [vmem:[#allocation2 + $0x10] sm:$0xf] %v2391_v14  ;;  %1810 = vst [vmem:[#allocation2 + $0x50] sm:$0xf] %v2399_v15  ;;  %v1723_v20 = vmax.f32 %v1669_v16, 0.0  ;;  %v1731_v21 = vmax.f32 %v1701_v17, 0.0  ;;  %v2522_v22 = vadd.f32 %v2521_v18, %v2520_v12  ;;  %v2546_v23 = vadd.f32 %v2545_v19, %v2544_v13 }
 0x49f   : > { %v2523_v24 = vpop.f32.mrf.mxu0  ;;  %v2547_v25 = vpop.f32.mrf.mxu1 }
 0x4a0   : > { %v2392_v26 = vpack.c.bf16 %v1723_v20, %v1723_v20  ;;  %v2400_v27 = vpack.c.bf16 %v1731_v21, %v1731_v21  ;;  %v1674_v28 = vadd.f32 %v2522_v22, %v3713_v37  ;;  %v1706_v29 = vadd.f32 %v2546_v23, %v3713_v37 }
 0x4a1   : > { %v2524_v30 = vpop.f32.mrf.mxu0  ;;  %v2548_v31 = vpop.f32.mrf.mxu1 }
 0x4a2   : > { %1803 = vst [vmem:[#allocation2 + $0x18] sm:$0xf] %v2392_v26  ;;  %1811 = vst [vmem:[#allocation2 + $0x58] sm:$0xf] %v2400_v27  ;;  %v1724_v32 = vmax.f32 %v1674_v28, 0.0  ;;  %v1732_v33 = vmax.f32 %v1706_v29, 0.0  ;;  %v2525_v34 = vadd.f32 %v2524_v30, %v2523_v24  ;;  %v2549_v35 = vadd.f32 %v2548_v31, %v2547_v25 }
 0x4a3   : > { %v2526_v36 = vpop.f32.mrf.mxu0  ;;  %v2550_v38 = vpop.f32.mrf.mxu1 }
 0x4a4   : > { %v2393_v39 = vpack.c.bf16 %v1724_v32, %v1724_v32  ;;  %v2401_v40 = vpack.c.bf16 %v1732_v33, %v1732_v33  ;;  %v1677_v41 = vadd.f32 %v2525_v34, %v3713_v37  ;;  %v1709_v42 = vadd.f32 %v2549_v35, %v3713_v37 }
 0x4a5   : > { %v2527_v43 = vpop.f32.mrf.mxu0  ;;  %v2551_v44 = vpop.f32.mrf.mxu1 }
 0x4a6   : > { %1804 = vst [vmem:[#allocation2 + $0x20] sm:$0xf] %v2393_v39  ;;  %1812 = vst [vmem:[#allocation2 + $0x60] sm:$0xf] %v2401_v40  ;;  %v1725_v45 = vmax.f32 %v1677_v41, 0.0  ;;  %v1733_v48 = vmax.f32 %v1709_v42, 0.0  ;;  %v2528_v49 = vadd.f32 %v2527_v43, %v2526_v36  ;;  %v2552_v50 = vadd.f32 %v2551_v44, %v2550_v38 }
 0x4a7   : > { %v2529_v51 = vpop.f32.mrf.mxu0  ;;  %v2553_v52 = vpop.f32.mrf.mxu1 }
 0x4a8   : > { %v2394_v53 = vpack.c.bf16 %v1725_v45, %v1725_v45  ;;  %v2402_v54 = vpack.c.bf16 %v1733_v48, %v1733_v48  ;;  %v1682_v55 = vadd.f32 %v2528_v49, %v3713_v37  ;;  %v1714_v56 = vadd.f32 %v2552_v50, %v3713_v37 }
 0x4a9   : > { %v2530_v46 = vpop.f32.mrf.mxu0  ;;  %v2554_v57 = vpop.f32.mrf.mxu1 }
 0x4aa   : > { %1805 = vst [vmem:[#allocation2 + $0x28] sm:$0xf] %v2394_v53  ;;  %1813 = vst [vmem:[#allocation2 + $0x68] sm:$0xf] %v2402_v54  ;;  %v1726_v47 = vmax.f32 %v1682_v55, 0.0  ;;  %v1734_v58 = vmax.f32 %v1714_v56, 0.0  ;;  %v2531_v59 = vadd.f32 %v2530_v46, %v2529_v51  ;;  %v2555_v60 = vadd.f32 %v2554_v57, %v2553_v52 }
 0x4ac   : > { %v2395_v61 = vpack.c.bf16 %v1726_v47, %v1726_v47  ;;  %v2403_v62 = vpack.c.bf16 %v1734_v58, %v1734_v58  ;;  %v1685_v63 = vadd.f32 %v2531_v59, %v3713_v37  ;;  %v1717_v0 = vadd.f32 %v2555_v60, %v3713_v37 }
 0x4ae   : > { %1806 = vst [vmem:[#allocation2 + $0x30] sm:$0xf] %v2395_v61  ;;  %1814 = vst [vmem:[#allocation2 + $0x70] sm:$0xf] %v2403_v62  ;;  %v1727_v1 = vmax.f32 %v1685_v63, 0.0  ;;  %v1735_v2 = vmax.f32 %v1717_v0, 0.0 }
 0x4b0   : > { %v2396_v3 = vpack.c.bf16 %v1727_v1, %v1727_v1  ;;  %v2404_v4 = vpack.c.bf16 %v1735_v2, %v1735_v2 }
 0x4b2   : > { %1807 = vst [vmem:[#allocation2 + $0x38] sm:$0xf] %v2396_v3  ;;  %1815 = vst [vmem:[#allocation2 + $0x78] sm:$0xf] %v2404_v4 }
 0x4b3 PF: > { %s3866_s26 = sld [smem:[#allocation25_spill]] }
 0x4b9   : > { %p1816_p12 = scmp.eq.s32.totalorder %s3866_s26, 1 }
 0x4bb   : > { %p1817_p11 = pnand %p1816_p12, %p1292_p10 }
 0x4bc   : > { %s3868_s6 = sld [smem:[#allocation33_spill]] (!%p1817_p11) }
 0x4bd   : > { %1820 = sbr.rel (%p1817_p11) target bundleno = 1788 (0x6fc), region = 116  ;;  %s3869_s11 = sld [smem:[#allocation37_spill]] (!%p1817_p11) }
 0x4be   : > { %s3870_s4 = sld [smem:[#allocation38_spill]] (!%p1817_p11) }
 0x4bf   : > { %s3871_s20 = sld [smem:[#allocation39_spill]] (!%p1817_p11) }
 0x4c2   : > { %v3275_v5 = vmov 0.0   ;;  %v2942_v6 = vld [vmem:[#allocation2 + $0x70] ss:$8 sps:$4 sm:$0xff]   ;;  %vm3276_vm0 = vmmov 0   ;;  %v2943_v37 = vld [vmem:[#allocation2 + $0x60] ss:$8 sps:$4 sm:$0xff]  }
 0x4c3   : > { %2670 = vmatprep.subr.bf16.mxu0 %v3275_v5  ;;  %2686 = vmatprep.mubr.msk.bf16.mxu0 %vm3276_vm0, %v3275_v5  ;;  %v2944_v7 = vld [vmem:[#allocation2 + $0x50] ss:$8 sps:$4 sm:$0xff]   ;;  %v2945_v9 = vld [vmem:[#allocation2 + $0x40] ss:$8 sps:$4 sm:$0xff]   ;;  %vm2047_vm1 = vcmask 1041408   ;;  %vm2059_vm2 = vcmask 1024  }
 0x4c4   : > { %2690 = vmatprep.subr.bf16.mxu1 %v3275_v5  ;;  %2706 = vmatprep.mubr.msk.bf16.mxu1 %vm3276_vm0, %v3275_v5  ;;  %v2950_v8 = vld [vmem:[#allocation15 + $0x38] sm:$0xff]   ;;  %v2951_v10 = vld [vmem:[#allocation15 + $0x30] sm:$0xff]   ;;  %v2952_v12 = vld [vmem:[#allocation15 + $0x28] sm:$0xff]  }
 0x4c5   : > { %2671 = vmatpush3.bf16.msra.mxu0 %v2942_v6  ;;  %2691 = vmatpush3.bf16.msra.mxu1 %v2950_v8  ;;  %v2946_v11 = vld [vmem:[#allocation2 + $0x30] ss:$8 sps:$4 sm:$0xff]   ;;  %v2947_v13 = vld [vmem:[#allocation2 + $0x20] ss:$8 sps:$4 sm:$0xff]  }
 0x4c6   : > { %2672 = vmatprep.subr.bf16.mxu0 %v3275_v5  ;;  %2692 = vmatprep.subr.bf16.mxu1 %v3275_v5  ;;  %v2953_v14 = vld [vmem:[#allocation15 + $0x20] sm:$0xff]   ;;  %v2948_v15 = vld [vmem:[#allocation2 + $0x10] ss:$8 sps:$4 sm:$0xff]   ;;  %v1821_v19 = vld [vmem:[%s3868_s6] sm:$0x1] }
 0x4c7   : > { %v2954_v16 = vld [vmem:[#allocation15 + $0x18] sm:$0xff]   ;;  %v2955_v18 = vld [vmem:[#allocation15 + $0x10] sm:$0xff]   ;;  %v2956_v20 = vld [vmem:[#allocation15 + $0x8] sm:$0xff]  }
 0x4c8   : > { %v2949_v17 = vld [vmem:[#allocation2] ss:$8 sps:$4 sm:$0xff]  }
 0x4c9   : > { %2673 = vmatpush3.bf16.msra.mxu0 %v2943_v37  ;;  %2693 = vmatpush3.bf16.msra.mxu1 %v2951_v10  ;;  %v2957_v21 = vld [vmem:[#allocation15] sm:$0xff]   ;;  %v2356_v27 = vld [vmem:[%s3869_s11] ss:$0 sm:$0xff] }
 0x4ca   : > { %2674 = vmatprep.subr.bf16.mxu0 %v3275_v5  ;;  %2694 = vmatprep.subr.bf16.mxu1 %v3275_v5  ;;  %v2365_v31 = vld [vmem:[%s3870_s4] ss:$0 sm:$0xff] }
 0x4cb   : > { %v2366_v38 = vld [vmem:[#allocation4] ss:$0 sm:$0xff] }
 0x4cd   : > { %2675 = vmatpush3.bf16.msra.mxu0 %v2944_v7  ;;  %2695 = vmatpush3.bf16.msra.mxu1 %v2952_v12 }
 0x4ce   : > { %2676 = vmatprep.subr.bf16.mxu0 %v3275_v5  ;;  %2696 = vmatprep.subr.bf16.mxu1 %v3275_v5 }
 0x4d1   : > { %2677 = vmatpush3.bf16.msra.mxu0 %v2945_v9  ;;  %2697 = vmatpush3.bf16.msra.mxu1 %v2953_v14 }
 0x4d2   : > { %2678 = vmatprep.subr.bf16.mxu0 %v3275_v5  ;;  %2698 = vmatprep.subr.bf16.mxu1 %v3275_v5 }
 0x4d5   : > { %2679 = vmatpush3.bf16.msra.mxu0 %v2946_v11  ;;  %2699 = vmatpush3.bf16.msra.mxu1 %v2954_v16 }
 0x4d6   : > { %2680 = vmatprep.subr.bf16.mxu0 %v3275_v5  ;;  %2700 = vmatprep.subr.bf16.mxu1 %v3275_v5 }
 0x4d9   : > { %2681 = vmatpush3.bf16.msra.mxu0 %v2947_v13  ;;  %2701 = vmatpush3.bf16.msra.mxu1 %v2955_v18 }
 0x4da   : > { %2682 = vmatprep.subr.bf16.mxu0 %v3275_v5  ;;  %2702 = vmatprep.subr.bf16.mxu1 %v3275_v5 }
 0x4dd   : > { %2683 = vmatpush3.bf16.msra.mxu0 %v2948_v15  ;;  %2703 = vmatpush3.bf16.msra.mxu1 %v2956_v20 }
 0x4de   : > { %2684 = vmatprep.subr.bf16.mxu0 %v3275_v5  ;;  %2704 = vmatprep.subr.bf16.mxu1 %v3275_v5 }
 0x4e1   : > { %2685 = vmatpush3.bf16.msra.mxu0 %v2949_v17  ;;  %2705 = vmatpush3.bf16.msra.mxu1 %v2957_v21 }
 0x4e4   : > { %2687 = vmatmul.mubr.bf16.vlgmr.msra.gmra.mxu0 %v1821_v19 }
 0x5a4   : > { %v1920_v22 = vpop.f32.mrf.mxu0 }
 0x5a5   : > { %v1926_v23 = vpack.c.bf16 %v1920_v22, %v1920_v22 }
 0x5a6   : > { %v2688_v24 = vpop.f32.mrf.mxu0 }
 0x5a7   : > { %2707 = vmatmul.mubr.bf16.vlgmr.msra.gmra.mxu1 %v1926_v23 }
 0x5a8   : > { %v1923_v25 = vpop.f32.mrf.mxu0 }
 0x5aa   : > { %v2689_v26 = vpop.f32.mrf.mxu0 }
 0x667   : > { %v2032_v28 = vpop.f32.mrf.mxu1 }
 0x668   : > { %v2033_v29 = vadd.f32 %v2356_v27, %v2032_v28 }
 0x669   : > { %v2708_v30 = vpop.f32.mrf.mxu1 }
 0x66a   : > { %v2038_v32 = vmax.f32 %v2033_v29, 0.0 }
 0x66b   : > { %v2035_v33 = vpop.f32.mrf.mxu1 }
 0x66c   : > { %v2046_v34 = vmul.f32 %v2365_v31, %v2038_v32 }
 0x66d   : > { %v2709_v35 = vpop.f32.mrf.mxu1 }
 0x66e   : > { %v2048_v36 = vsel %vm2047_vm1, %v2046_v34, 0.0 }
 0x66f   : > { %2049 = vadd.xlane.f32.xlu0 %v2048_v36 }
 0x6f8   : > { %v2050_v39 = vpop.xlane.xlu0 %2049 }
 0x6f9   : > { %v2058_v40 = vadd.f32 %v2366_v38, %v2050_v39 }
 0x6fb   : > { %2060 = vst.msk [vmem:[%s3871_s20] sm:$0x3] %vm2059_vm2, %v2058_v40 }
 0x6fc PF: > { %s35_s19 = sadd.s32 1, %s3260_s19   ;;  %s3872_s30 = sld [smem:[#allocation22_spill]] }
 0x6fd   : > { %p32_p9 = scmp.ge.s32.totalorder %s35_s19, 6   ;;  %s3873_s14 = sld [smem:[#allocation23_spill]] }
 0x6fe   : > { %s3874_s15 = sld [smem:[#allocation31_spill]]  ;;  %s3876_s27 = smov %s3224_s28 }
 0x6ff   : > { %s3875_s23 = sld [smem:[#allocation30_spill]]  ;;  %s3877_s28 = smov %s3228_s29 }
 0x700   : > { %s3878_s29 = smov %s3565_s12  ;;  %s3879_s12 = smov %s3252_s17 }
 0x701   : > { %s3880_s16 = smov %s3256_s18  ;;  %s3882_s18 = smov %s3888_s25 }
 0x702   :  { %34 = sbr.rel (!%p32_p9) target bundleno = 21 (0x15), region = 187 }
 0x705   : > { %s3881_s17 = smov %s3875_s23 }
 0x707   :  { %2072 = vsyncpa [#allocation6], 1 }
 0x708   :  { %2074 = vsyncpa [#allocation6 + $0x1], 1 }
 0x709   :  { %2075 = vsyncpa [#allocation8], 1 }
 0x70a   :  { %2077 = vsyncpa [#allocation8 + $0x1], 1 }
 0x70b   :  { %2078 = vsyncpa [#allocation11], 1 }
 0x70c   :  { %2080 = vsyncpa [#allocation11 + $0x1], 1 }
 0x70d   :  { %2081 = vsyncpa [#allocation14], 1 }
 0x70e   :  { %2083 = vsyncpa [#allocation14 + $0x1], 1 }

</bundles_post_ra>
